<compile_context>
chip_gen: v5e
topology: v5e:2x2
jax: 0.10.0
libtpu: 0.0.40
codegen_flags: <defaults>
</compile_context>

<pallas_src>
import jax
import jax.numpy as jnp
from jax.experimental import pallas as pl
from jax.experimental.pallas import tpu as pltpu

EPS = 1e-5


def _fused_kernel(x_ref, p1_ref, wt_ref, p2_ref, o_ref):
    # x_ref : [P,   C ]  activations, channels on lanes
    # p1_ref: [2,   C ]  row 0 = gamma1, row 1 = beta1
    # wt_ref: [Cin, CB]  conv weight block, [Cin, Cout] layout (bf16)
    # p2_ref: [2,   CB]  row 0 = gamma2, row 1 = beta2 (this Cout block)
    # o_ref : [P,   CB]  lane-dense output block
    x = x_ref[...].astype(jnp.float32)
    inv_p = 1.0 / x.shape[0]

    # --- BN1 (training mode, biased variance): single-pass stats folded into
    #     one per-channel scale/bias so the [P,C] tile sees a single FMA. ---
    mean1 = jnp.sum(x, axis=0, keepdims=True) * inv_p
    var1 = jnp.maximum(jnp.sum(x * x, axis=0, keepdims=True) * inv_p
                       - mean1 * mean1, 0.0)
    scale1 = p1_ref[0:1, :] * jax.lax.rsqrt(var1 + EPS)
    bias1 = p1_ref[1:2, :] - mean1 * scale1

    # --- ReLU; cast to the weight dtype (bf16) for an MXU-native matmul ---
    h = jnp.maximum(x * scale1 + bias1, 0.0).astype(wt_ref.dtype)

    # --- Conv2d 1x1 (no bias): y[p, co] = sum_ci h[p, ci] * w[ci, co] ---
    y = jnp.dot(h, wt_ref[...], preferred_element_type=jnp.float32)

    # --- BN2 (training mode) on the conv output, same folded form ---
    mean2 = jnp.sum(y, axis=0, keepdims=True) * inv_p
    var2 = jnp.maximum(jnp.sum(y * y, axis=0, keepdims=True) * inv_p
                       - mean2 * mean2, 0.0)
    scale2 = p2_ref[0:1, :] * jax.lax.rsqrt(var2 + EPS)
    bias2 = p2_ref[1:2, :] - mean2 * scale2

    o_ref[...] = (y * scale2 + bias2).astype(o_ref.dtype)


def _num_tensorcores():
    """Best-effort TensorCores-per-chip (2 on v4/v5p/v7x, else 1)."""
    try:
        info = pltpu.get_tpu_info()
        for attr in ("num_cores", "tensorcores_per_chip", "num_tensorcores",
                     "cores_per_chip", "core_count"):
            n = getattr(info, attr, None)
            if isinstance(n, int) and n >= 1:
                return min(n, 2)
    except Exception:
        pass
    try:
        dev = jax.devices()[0]
        n = getattr(dev, "num_cores", None)
        if isinstance(n, int) and n >= 1:
            return min(n, 2)
        kind = dev.device_kind.lower()
        if any(t in kind for t in ("v4", "v5p", "v7", "tpu7", "7x")):
            return 2
    except Exception:
        pass
    return 1


def fused_bn_relu_conv_bn(x_nchw, gamma1, beta1, conv_w_t, gamma2, beta2,
                          cout_blocks=None):
    """x_nchw: [N, C, H, W] f32.  conv_w_t: 1x1 conv weight pre-transposed to
    [Cin, Cout] (ideally already bf16 -- both done once at param-init time)."""
    N, C, H, W = x_nchw.shape
    Cin, Cout = conv_w_t.shape
    assert Cin == C
    P = N * H * W

    if cout_blocks is None:
        cout_blocks = 2 if (_num_tensorcores() >= 2 and Cout >= 256) else 1

    # Lane-dense output blocks: when splitting over 2 cores each block's Cout
    # extent must be a 128-multiple, so pad Cout up (padding sliced off below).
    if cout_blocks > 1:
        cb = pl.cdiv(pl.cdiv(Cout, cout_blocks), 128) * 128
        cout_pad = cb * cout_blocks
    else:
        cb = Cout
        cout_pad = Cout

    w_t, g2, b2 = conv_w_t, gamma2, beta2
    if cout_pad != Cout:
        pad = cout_pad - Cout
        w_t = jnp.pad(w_t, ((0, 0), (0, pad)))
        g2 = jnp.pad(g2, (0, pad), constant_values=1.0)
        b2 = jnp.pad(b2, (0, pad))

    # Coalesce the tiny BN-parameter inputs: 2 DMAs instead of 4.
    p1 = jnp.stack([gamma1, beta1])      # [2, C]
    p2 = jnp.stack([g2, b2])             # [2, cout_pad]

    # NCHW -> channels-last [P, C].
    # TODO(synk): if the producer/consumer use channels-last activations
    # directly, these two small wrapper transposes disappear entirely.
    x_pc = jnp.transpose(x_nchw, (0, 2, 3, 1)).reshape(P, C)

    cost = pl.CostEstimate(
        flops=2 * P * Cin * cout_pad,
        transcendentals=0,
        bytes_accessed=(x_pc.size * x_pc.dtype.itemsize
                        + w_t.size * w_t.dtype.itemsize
                        + p1.size * p1.dtype.itemsize
                        + p2.size * p2.dtype.itemsize
                        + P * cout_pad * x_nchw.dtype.itemsize))

    out_pc = pl.pallas_call(
        _fused_kernel,
        out_shape=jax.ShapeDtypeStruct((P, cout_pad), x_nchw.dtype),
        grid_spec=pltpu.PrefetchScalarGridSpec(
            num_scalar_prefetch=0,
            grid=(cout_blocks,),
            in_specs=[
                pl.BlockSpec((P, C), lambda j: (0, 0)),      # x (whole)
                pl.BlockSpec((2, C), lambda j: (0, 0)),      # gamma1/beta1
                pl.BlockSpec((Cin, cb), lambda j: (0, j)),   # weight block
                pl.BlockSpec((2, cb), lambda j: (0, j)),     # gamma2/beta2 block
            ],
            out_specs=pl.BlockSpec((P, cb), lambda j: (0, j)),
        ),
        compiler_params=pltpu.CompilerParams(
            dimension_semantics=("parallel",)),
        cost_estimate=cost,
    )(x_pc, p1, w_t, p2)

    # [P, Cout_pad] -> NCHW (drop padded output channels if any).
    out = out_pc[:, :Cout].reshape(N, H, W, Cout)
    return jnp.transpose(out, (0, 3, 1, 2))


def _reference(x_nchw, gamma1, beta1, conv_w, gamma2, beta2, matmul_dtype=None):
    """Pure-JAX reference of the PyTorch forward (training-mode BN).
    conv_w is in the module's natural [Cout, Cin] layout.  If matmul_dtype is
    given, conv operands are cast to it (matches bf16-matmul/f32-acc)."""
    def bn(x, g, b):
        m = jnp.mean(x, axis=(0, 2, 3), keepdims=True)
        v = jnp.mean((x - m) ** 2, axis=(0, 2, 3), keepdims=True)
        return (x - m) * jax.lax.rsqrt(v + EPS) * g.reshape(1, -1, 1, 1) \
               + b.reshape(1, -1, 1, 1)

    h = jnp.maximum(bn(x_nchw, gamma1, beta1), 0.0)
    w = conv_w
    if matmul_dtype is not None:
        h = h.astype(matmul_dtype)
        w = w.astype(matmul_dtype)
    y = jnp.einsum('nchw,oc->nohw', h, w,
                   preferred_element_type=jnp.float32).astype(jnp.float32)
    return bn(y, gamma2, beta2)


if __name__ == "__main__":
    key = jax.random.PRNGKey(0)
    k_x, k_w, k_g1, k_b1, k_g2, k_b2 = jax.random.split(key, 6)

    N, C, H, W = 1, 400, 7, 7   # shapes implied by the module
    x = jax.random.normal(k_x, (N, C, H, W), dtype=jnp.float32)
    conv_w = jax.random.normal(k_w, (C, C), dtype=jnp.float32) * 0.05  # [Cout, Cin]
    gamma1 = 1.0 + 0.1 * jax.random.normal(k_g1, (C,), dtype=jnp.float32)
    beta1 = 0.1 * jax.random.normal(k_b1, (C,), dtype=jnp.float32)
    gamma2 = 1.0 + 0.1 * jax.random.normal(k_g2, (C,), dtype=jnp.float32)
    beta2 = 0.1 * jax.random.normal(k_b2, (C,), dtype=jnp.float32)

    # One-time parameter prep (outside the hot path): bf16 cast + transpose to
    # [Cin, Cout] so the kernel's matmul is MXU-natural with no in-kernel
    # weight transpose.  Trailing training-mode BN absorbs per-channel scale.
    conv_w_t = jnp.transpose(conv_w).astype(jnp.bfloat16)

    # TODO(synk): running_mean/running_var momentum updates (module buffers)
    # are not produced; the forward output uses batch stats (training mode).
    out = fused_bn_relu_conv_bn(x, gamma1, beta1, conv_w_t, gamma2, beta2)
    out = jax.block_until_ready(out)
    assert out.shape == (N, C, H, W)

    # Strict check against a reference with matched matmul precision
    # (bf16 operands, f32 accumulation) -> validates the kernel itself.
    ref_mixed = _reference(x, gamma1, beta1, conv_w.astype(jnp.bfloat16),
                           gamma2, beta2, matmul_dtype=jnp.bfloat16)
    assert jnp.allclose(out, ref_mixed, atol=2e-3, rtol=2e-3)

    # Sanity check against the full-f32 module semantics; bf16 weight
    # quantization error is absorbed to the few-1e-3 level by the trailing BN.
    ref_f32 = _reference(x, gamma1, beta1, conv_w, gamma2, beta2)
    assert jnp.allclose(out, ref_f32, atol=3e-2, rtol=3e-2)

    print("KERNEL_OK")
</pallas_src>

<mosaic_0001>
module attributes {stable_mosaic.version = 11 : i64} {
  func.func @_fused_kernel(%arg0: i32, %arg1: memref<49x400xf32, #tpu.memory_space<vmem>>, %arg2: memref<2x400xf32, #tpu.memory_space<vmem>>, %arg3: memref<400x400xbf16, #tpu.memory_space<vmem>>, %arg4: memref<2x400xf32, #tpu.memory_space<vmem>>, %arg5: memref<49x400xf32, #tpu.memory_space<vmem>>) attributes {dimension_semantics = [#tpu.dimension_semantics<parallel>], iteration_bounds = array<i64: 1>, scalar_prefetch = 0 : i64, scratch_operands = 0 : i64, tpu.core_type = #tpu.core_type<tc>, window_params = [{pipeline_mode = #tpu.pipeline_mode<synchronous>, transform_indices = @transform_0, window_bounds = array<i64: 49, 400>}, {pipeline_mode = #tpu.pipeline_mode<synchronous>, transform_indices = @transform_1, window_bounds = array<i64: 2, 400>}, {transform_indices = @transform_2, window_bounds = array<i64: 400, 400>}, {transform_indices = @transform_3, window_bounds = array<i64: 2, 400>}, {transform_indices = @transform_4, window_bounds = array<i64: 49, 400>}]} {
    %c0 = arith.constant 0 : index
    %c0_0 = arith.constant 0 : index
    %0 = vector.load %arg1[%c0, %c0_0] : memref<49x400xf32, #tpu.memory_space<vmem>>, vector<49x400xf32>
    %cst = arith.constant dense<0.000000e+00> : vector<400xf32>
    %1 = vector.multi_reduction <add>, %0, %cst [0] : vector<49x400xf32> to vector<400xf32>
    %2 = vector.shape_cast %1 : vector<400xf32> to vector<1x400xf32>
    %cst_1 = arith.constant 0.0204081628 : f32
    %3 = vector.broadcast %cst_1 : f32 to vector<1x400xf32>
    %4 = arith.mulf %2, %3 : vector<1x400xf32>
    %5 = arith.mulf %0, %0 : vector<49x400xf32>
    %cst_2 = arith.constant dense<0.000000e+00> : vector<400xf32>
    %6 = vector.multi_reduction <add>, %5, %cst_2 [0] : vector<49x400xf32> to vector<400xf32>
    %7 = vector.shape_cast %6 : vector<400xf32> to vector<1x400xf32>
    %cst_3 = arith.constant 0.0204081628 : f32
    %8 = vector.broadcast %cst_3 : f32 to vector<1x400xf32>
    %9 = arith.mulf %7, %8 : vector<1x400xf32>
    %10 = arith.mulf %4, %4 : vector<1x400xf32>
    %11 = arith.subf %9, %10 : vector<1x400xf32>
    %cst_4 = arith.constant 0.000000e+00 : f32
    %12 = vector.broadcast %cst_4 : f32 to vector<1x400xf32>
    %13 = arith.maximumf %11, %12 : vector<1x400xf32>
    %c0_5 = arith.constant 0 : index
    %c0_6 = arith.constant 0 : index
    %14 = vector.load %arg2[%c0_5, %c0_6] : memref<2x400xf32, #tpu.memory_space<vmem>>, vector<1x400xf32>
    %cst_7 = arith.constant 9.99999974E-6 : f32
    %15 = vector.broadcast %cst_7 : f32 to vector<1x400xf32>
    %16 = arith.addf %13, %15 : vector<1x400xf32>
    %17 = math.rsqrt %16 : vector<1x400xf32>
    %18 = arith.mulf %14, %17 : vector<1x400xf32>
    %c1 = arith.constant 1 : index
    %c0_8 = arith.constant 0 : index
    %19 = vector.load %arg2[%c1, %c0_8] : memref<2x400xf32, #tpu.memory_space<vmem>>, vector<1x400xf32>
    %20 = arith.mulf %4, %18 : vector<1x400xf32>
    %21 = arith.subf %19, %20 : vector<1x400xf32>
    %22 = vector.broadcast %18 : vector<1x400xf32> to vector<49x400xf32>
    %23 = arith.mulf %0, %22 : vector<49x400xf32>
    %24 = vector.broadcast %21 : vector<1x400xf32> to vector<49x400xf32>
    %25 = arith.addf %23, %24 : vector<49x400xf32>
    %cst_9 = arith.constant 0.000000e+00 : f32
    %26 = vector.broadcast %cst_9 : f32 to vector<49x400xf32>
    %27 = arith.maximumf %25, %26 : vector<49x400xf32>
    %28 = arith.truncf %27 : vector<49x400xf32> to vector<49x400xbf16>
    %c0_10 = arith.constant 0 : index
    %c0_11 = arith.constant 0 : index
    %29 = vector.load %arg3[%c0_10, %c0_11] : memref<400x400xbf16, #tpu.memory_space<vmem>>, vector<400x400xbf16>
    %cst_12 = arith.constant dense<0.000000e+00> : vector<49x400xf32>
    %30 = tpu.matmul %28, %29, %cst_12 {dimension_numbers = #tpu.dot_dimension_numbers<[1], [0], [0], [1], [0, 0, 1, 1], [], []>} : vector<49x400xbf16>, vector<400x400xbf16>, vector<49x400xf32> -> vector<49x400xf32>
    %cst_13 = arith.constant dense<0.000000e+00> : vector<400xf32>
    %31 = vector.multi_reduction <add>, %30, %cst_13 [0] : vector<49x400xf32> to vector<400xf32>
    %32 = vector.shape_cast %31 : vector<400xf32> to vector<1x400xf32>
    %cst_14 = arith.constant 0.0204081628 : f32
    %33 = vector.broadcast %cst_14 : f32 to vector<1x400xf32>
    %34 = arith.mulf %32, %33 : vector<1x400xf32>
    %35 = arith.mulf %30, %30 : vector<49x400xf32>
    %cst_15 = arith.constant dense<0.000000e+00> : vector<400xf32>
    %36 = vector.multi_reduction <add>, %35, %cst_15 [0] : vector<49x400xf32> to vector<400xf32>
    %37 = vector.shape_cast %36 : vector<400xf32> to vector<1x400xf32>
    %cst_16 = arith.constant 0.0204081628 : f32
    %38 = vector.broadcast %cst_16 : f32 to vector<1x400xf32>
    %39 = arith.mulf %37, %38 : vector<1x400xf32>
    %40 = arith.mulf %34, %34 : vector<1x400xf32>
    %41 = arith.subf %39, %40 : vector<1x400xf32>
    %cst_17 = arith.constant 0.000000e+00 : f32
    %42 = vector.broadcast %cst_17 : f32 to vector<1x400xf32>
    %43 = arith.maximumf %41, %42 : vector<1x400xf32>
    %c0_18 = arith.constant 0 : index
    %c0_19 = arith.constant 0 : index
    %44 = vector.load %arg4[%c0_18, %c0_19] : memref<2x400xf32, #tpu.memory_space<vmem>>, vector<1x400xf32>
    %cst_20 = arith.constant 9.99999974E-6 : f32
    %45 = vector.broadcast %cst_20 : f32 to vector<1x400xf32>
    %46 = arith.addf %43, %45 : vector<1x400xf32>
    %47 = math.rsqrt %46 : vector<1x400xf32>
    %48 = arith.mulf %44, %47 : vector<1x400xf32>
    %c1_21 = arith.constant 1 : index
    %c0_22 = arith.constant 0 : index
    %49 = vector.load %arg4[%c1_21, %c0_22] : memref<2x400xf32, #tpu.memory_space<vmem>>, vector<1x400xf32>
    %50 = arith.mulf %34, %48 : vector<1x400xf32>
    %51 = arith.subf %49, %50 : vector<1x400xf32>
    %52 = vector.broadcast %48 : vector<1x400xf32> to vector<49x400xf32>
    %53 = arith.mulf %30, %52 : vector<49x400xf32>
    %54 = vector.broadcast %51 : vector<1x400xf32> to vector<49x400xf32>
    %55 = arith.addf %53, %54 : vector<49x400xf32>
    %c0_23 = arith.constant 0 : index
    %c0_24 = arith.constant 0 : index
    %56 = vector.load %arg5[%c0_23, %c0_24] : memref<49x400xf32, #tpu.memory_space<vmem>>, vector<49x400xf32>
    tpu.vector_store %arg5[%c0_23, %c0_24], %55 {strides = array<i32>} : memref<49x400xf32, #tpu.memory_space<vmem>>, vector<49x400xf32>,
    return
  }
  func.func @transform_0(%arg0: i32) -> (i32, i32) {
    %c0_i32 = arith.constant 0 : i32
    %c0_i32_0 = arith.constant 0 : i32
    %c0_i32_1 = arith.constant 0 : i32
    return %c0_i32, %c0_i32_0 : i32, i32
  }
  func.func @transform_1(%arg0: i32) -> (i32, i32) {
    %c0_i32 = arith.constant 0 : i32
    %c0_i32_0 = arith.constant 0 : i32
    %c0_i32_1 = arith.constant 0 : i32
    return %c0_i32, %c0_i32_0 : i32, i32
  }
  func.func @transform_2(%arg0: i32) -> (i32, i32) {
    %c0_i32 = arith.constant 0 : i32
    %c0_i32_0 = arith.constant 0 : i32
    return %c0_i32, %arg0 : i32, i32
  }
  func.func @transform_3(%arg0: i32) -> (i32, i32) {
    %c0_i32 = arith.constant 0 : i32
    %c0_i32_0 = arith.constant 0 : i32
    return %c0_i32, %arg0 : i32, i32
  }
  func.func @transform_4(%arg0: i32) -> (i32, i32) {
    %c0_i32 = arith.constant 0 : i32
    %c0_i32_0 = arith.constant 0 : i32
    return %c0_i32, %arg0 : i32, i32
  }
}

</mosaic_0001>

<bundles_post_ra>
// kernel: tpu_custom_call.1
= control target key start
LH: loop header
LB: loop body
LE: loop exit
PB: predicated region body
PF: predicated region fallthrough
CT: control target
= control target key end

     0   :  { %9 = vsyncpa [#allocation3], 0  ;;  %s3417_s0 = inlined_call_operand.hbm [shape: f32[49,400], index: 0, kind: input, shape index: {}]   ;;  %s3418_s1 = inlined_call_operand.hbm [shape: f32[2,400], index: 1, kind: input, shape index: {}]   ;;  %s3419_s2 = inlined_call_operand.hbm [shape: bf16[400,400], index: 2, kind: input, shape index: {}]   ;;  %s3420_s3 = inlined_call_operand.hbm [shape: f32[2,400], index: 3, kind: input, shape index: {}]   ;;  %s3421_s4 = inlined_call_operand.hbm [shape: f32[49,400], index: 4, kind: output, shape index: {}]  }
   0x1   :  { %10 = vsyncpa [#allocation6], 0 }
   0x2   :  { %11 = vsyncpa [#allocation9], 0  ;;  %s31_s17 = sshll.u32 %s3418_s1, 4  ;;  %s32_s17 = int_to_ptr.hbm [resolvable:$true] %s31_s17 }
   0x3   :  { %12 = vsyncpa [#allocation4], 0  ;;  %s2559_s18 = smov [#allocation5]   ;;  %s17_s22 = sshll.u32 %s3417_s0, 4  ;;  %s18_s22 = int_to_ptr.hbm [resolvable:$true] %s17_s22 }
   0x4   :  { %s33_s19 = sshll.u32 %s2559_s18, 4  ;;  %s2560_s23 = smov [#allocation2]   ;;  %s34_s19 = int_to_ptr.vmem [resolvable:$true] %s33_s19 }
   0x5   :  { %36 = dma.hbm_to_vmem [thread:$0]  %s32_s17, 128, %s34_s19, [#allocation6]  }
   0x6   :  { %s19_s24 = sshll.u32 %s2560_s23, 4  ;;  %s2561_s25 = smov 512   ;;  %s20_s24 = int_to_ptr.vmem [resolvable:$true] %s19_s24 }
   0x7   :  { %s2562_s26 = smov 32   ;;  %s41_s28 = sshll.u32 %s3419_s2, 4  ;;  %s42_s28 = int_to_ptr.hbm [resolvable:$true] %s41_s28 }
   0x8   :  { %25 = dma.hbm_to_vmem [thread:$0]  %s18_s22, 3584, %s20_s24, [#allocation3], %s2561_s25, %s2561_s25, %s2562_s26  }
   0x9   :  { %s2563_s29 = smov [#allocation7]   ;;  %s55_s6 = sshll.u32 %s3420_s3, 4  ;;  %s56_s6 = int_to_ptr.hbm [resolvable:$true] %s55_s6 }
   0xa   :  { %s43_s30 = sshll.u32 %s2563_s29, 4  ;;  %s2564_s7 = smov 256   ;;  %s44_s30 = int_to_ptr.vmem [resolvable:$true] %s43_s30 }
   0xb   :  { %s2565_s8 = smov 16   ;;  %s2566_s9 = smov [#allocation8]  }
   0xc   :  { %49 = dma.hbm_to_vmem [thread:$0]  %s42_s28, 12800, %s44_s30, [#allocation6], %s2564_s7, %s2564_s7, %s2565_s8  }
   0xd   :  { %s57_s10 = sshll.u32 %s2566_s9, 4  ;;  %s58_s10 = int_to_ptr.vmem [resolvable:$true] %s57_s10 }
   0xe   :  { %60 = dma.hbm_to_vmem [thread:$0]  %s56_s6, 128, %s58_s10, [#allocation9]  }
   0xf   :  { %2551 = dma.done.wait [#allocation3], 3584  }
  0x10   :  { %2552 = vsyncadd [#allocation3], 4294963712 }
  0x11   :  { %2553 = dma.done.wait [#allocation6], 12928  }
  0x12   :  { %2554 = vsyncadd [#allocation6], 4294954368 }
  0x13   :  { %2555 = dma.done.wait [#allocation9], 128  }
  0x14   :  { %2556 = vsyncadd [#allocation9], 4294967168  ;;  %v2004_v0 = vld [vmem:[#allocation7 + $0xe0] sm:$0xf]  ;;  %v2336_v1 = vld [vmem:[#allocation7 + $0xec] sm:$0xf0] }
  0x15   :  { %v2132_v2 = vld [vmem:[#allocation7 + $0x1e0] sm:$0xf]  ;;  %v2005_v3 = vor.u32 %v2336_v1, %v2004_v0  ;;  %v2368_v4 = vld [vmem:[#allocation7 + $0x1ec] sm:$0xf0]  ;;  %vm146_vm0 = vcmask 130048   ;;  %v2620_v53 = vld [vmem:[#allocation2] sm:$0xff] }
  0x16   :  { %v2260_v5 = vld [vmem:[#allocation7 + $0x2e0] sm:$0xf]  ;;  %v2400_v6 = vld [vmem:[#allocation7 + $0x2ec] sm:$0xf0]  ;;  %v2133_v7 = vor.u32 %v2368_v4, %v2132_v2  ;;  %v2632_v60 = vld [vmem:[#allocation2 + $0x10] sm:$0xff]  ;;  %vm111_vm1 = vcmask 1040384  }
  0x17   :  { %v2261_v8 = vor.u32 %v2400_v6, %v2260_v5  ;;  %v1988_v9 = vld [vmem:[#allocation7 + $0xc0] sm:$0xf]  ;;  %v2332_v10 = vld [vmem:[#allocation7 + $0xcc] sm:$0xf0]  ;;  %1080 = vmatpush.bf16.msra.mxu0 %v2005_v3  ;;  %v2638_v63 = vld [vmem:[#allocation2 + $0x20] sm:$0xff]  ;;  %vm3431_vm2 = vcmask 122880  }
  0x18   :  { %v2116_v11 = vld [vmem:[#allocation7 + $0x1c0] sm:$0xf]  ;;  %v1989_v12 = vor.u32 %v2332_v10, %v1988_v9  ;;  %v2364_v13 = vld [vmem:[#allocation7 + $0x1cc] sm:$0xf0]  ;;  %1108 = vmatpush.bf16.msra.mxu1 %v2133_v7  ;;  %v2642_v1 = vld [vmem:[#allocation2 + $0x30] sm:$0xff]  ;;  %vm326_vm15 = vcmask 1042434  }
  0x19   :  { %v2244_v14 = vld [vmem:[#allocation7 + $0x2c0] sm:$0xf]  ;;  %v2396_v15 = vld [vmem:[#allocation7 + $0x2cc] sm:$0xf0]  ;;  %1136 = vmatpush.bf16.msra.mxu2 %v2261_v8  ;;  %v2117_v16 = vor.u32 %v2364_v13, %v2116_v11  ;;  %v2660_v10 = vld [vmem:[#allocation2 + $0x40] sm:$0xff]  ;;  %s2567_s2 = smov [#allocation10]  }
  0x1a   :  { %v2245_v17 = vor.u32 %v2396_v15, %v2244_v14  ;;  %v1972_v18 = vld [vmem:[#allocation7 + $0xa0] sm:$0xf]  ;;  %v2328_v19 = vld [vmem:[#allocation7 + $0xac] sm:$0xf0]  ;;  %v133_v14 = vadd.f32 %v2642_v1, %v2632_v60  ;;  %s1873_s3 = sshll.u32 %s2567_s2, 4  ;;  %s1875_s13 = sshll.u32 %s3421_s4, 4  ;;  %s1874_s3 = int_to_ptr.vmem [resolvable:$true] %s1873_s3  ;;  %s1876_s13 = int_to_ptr.hbm [resolvable:$true] %s1875_s13 }
  0x1b   :  { %v2100_v20 = vld [vmem:[#allocation7 + $0x1a0] sm:$0xf]  ;;  %v2360_v21 = vld [vmem:[#allocation7 + $0x1ac] sm:$0xf0]  ;;  %1081 = vmatpush.bf16.msra.mxu0 %v1989_v12  ;;  %v1973_v24 = vor.u32 %v2328_v19, %v1972_v18  ;;  %v106_v12 = vadd.f32 %v2638_v63, %v2620_v53  ;;  %v2678_v19 = vld [vmem:[#allocation2 + $0x60] sm:$0xff] }
  0x1c   :  { %v2228_v22 = vld [vmem:[#allocation7 + $0x2a0] sm:$0xf]  ;;  %v2392_v23 = vld [vmem:[#allocation7 + $0x2ac] sm:$0xf0]  ;;  %1109 = vmatpush.bf16.msra.mxu1 %v2117_v16  ;;  %v2101_v25 = vor.u32 %v2360_v21, %v2100_v20 }
  0x1d   :  { %1137 = vmatpush.bf16.msra.mxu2 %v2245_v17  ;;  %v2229_v26 = vor.u32 %v2392_v23, %v2228_v22  ;;  %v1956_v27 = vld [vmem:[#allocation7 + $0x80] sm:$0xf]  ;;  %v2324_v28 = vld [vmem:[#allocation7 + $0x8c] sm:$0xf0]  ;;  %v2674_v17 = vld [vmem:[#allocation2 + $0x50] sm:$0xff] }
  0x1e   :  { %v2084_v29 = vld [vmem:[#allocation7 + $0x180] sm:$0xf]  ;;  %v2356_v30 = vld [vmem:[#allocation7 + $0x18c] sm:$0xf0]  ;;  %v1957_v33 = vor.u32 %v2324_v28, %v1956_v27  ;;  %v2684_v22 = vld [vmem:[#allocation2 + $0x70] sm:$0xff] }
  0x1f   :  { %v2212_v31 = vld [vmem:[#allocation7 + $0x280] sm:$0xf]  ;;  %v2388_v32 = vld [vmem:[#allocation7 + $0x28c] sm:$0xf0]  ;;  %1082 = vmatpush.bf16.msra.mxu0 %v1973_v24  ;;  %v2085_v34 = vor.u32 %v2356_v30, %v2084_v29  ;;  %v107_v24 = vadd.f32 %v106_v12, %v2660_v10  ;;  %v2695_v30 = vld [vmem:[#allocation2 + $0x80] sm:$0xff] }
  0x20   :  { %1110 = vmatpush.bf16.msra.mxu1 %v2101_v25  ;;  %v2213_v35 = vor.u32 %v2388_v32, %v2212_v31  ;;  %v1940_v36 = vld [vmem:[#allocation7 + $0x60] sm:$0xf]  ;;  %v2320_v37 = vld [vmem:[#allocation7 + $0x6c] sm:$0xf0]  ;;  %v2699_v32 = vld [vmem:[#allocation2 + $0x90] sm:$0xff] }
  0x21   :  { %1138 = vmatpush.bf16.msra.mxu2 %v2229_v26  ;;  %v2068_v38 = vld [vmem:[#allocation7 + $0x160] sm:$0xf]  ;;  %v2352_v39 = vld [vmem:[#allocation7 + $0x16c] sm:$0xf0]  ;;  %v1941_v44 = vor.u32 %v2320_v37, %v1940_v36  ;;  %v134_v26 = vadd.f32 %v133_v14, %v2674_v17  ;;  %3433 = vst [vmem:[#allocation16_spill] sm:$0xff] %v2699_v32  ;;  %v171_v14 = vmul.f32 %v2620_v53, %v2620_v53 }
  0x22   :  { %v2196_v40 = vld [vmem:[#allocation7 + $0x260] sm:$0xf]  ;;  %v2384_v41 = vld [vmem:[#allocation7 + $0x26c] sm:$0xf0]  ;;  %v2069_v49 = vor.u32 %v2352_v39, %v2068_v38  ;;  %v2707_v38 = vld [vmem:[#allocation2 + $0xa0] sm:$0xff] }
  0x23   :  { %v2608_v42 = vld [vmem:[#allocation7 + $0x40] sm:$0xf]  ;;  %v2610_v43 = vld [vmem:[#allocation7 + $0x4c] sm:$0xf0]  ;;  %1083 = vmatpush.bf16.msra.mxu0 %v1957_v33  ;;  %v2197_v50 = vor.u32 %v2384_v41, %v2196_v40  ;;  %3435 = vst [vmem:[#allocation18_spill] sm:$0xff] %v2707_v38  ;;  %v108_v40 = vadd.f32 %v107_v24, %v2678_v19 }
  0x24   :  { %v2612_v45 = vld [vmem:[#allocation7 + $0x140] sm:$0xf]  ;;  %v2614_v46 = vld [vmem:[#allocation7 + $0x14c] sm:$0xf0]  ;;  %1111 = vmatpush.bf16.msra.mxu1 %v2085_v34  ;;  %v1925_v62 = vor.u32 %v2610_v43, %v2608_v42  ;;  %v135_v42 = vadd.f32 %v134_v26, %v2684_v22  ;;  %v173_v26 = vmul.f32 %v2632_v60, %v2632_v60 }
  0x25   :  { %v2616_v47 = vld [vmem:[#allocation7 + $0x240] sm:$0xf]  ;;  %v2618_v48 = vld [vmem:[#allocation7 + $0x24c] sm:$0xf0]  ;;  %1139 = vmatpush.bf16.msra.mxu2 %v2213_v35  ;;  %v2053_v15 = vor.u32 %v2614_v46, %v2612_v45 }
  0x26   :  { %v2276_v51 = vld [vmem:[#allocation7 + $0x300] sm:$0xf]  ;;  %v2404_v52 = vld [vmem:[#allocation7 + $0x30c] sm:$0xf0]  ;;  %v2181_v16 = vor.u32 %v2618_v48, %v2616_v47  ;;  %v2720_v47 = vld [vmem:[#allocation2 + $0xb0] sm:$0xff] }
  0x27   :  { %v2622_v54 = vld [vmem:[#allocation7 + $0x20] sm:$0xf]  ;;  %v2624_v55 = vld [vmem:[#allocation7 + $0x2c] sm:$0xf0]  ;;  %v2277_v58 = vor.u32 %v2404_v52, %v2276_v51  ;;  %1084 = vmatpush.bf16.msra.mxu0 %v1941_v44  ;;  %v2730_v52 = vld [vmem:[#allocation2 + $0xd0] sm:$0x1] }
  0x28   :  { %v2626_v56 = vld [vmem:[#allocation7 + $0x120] sm:$0xf]  ;;  %v2628_v57 = vld [vmem:[#allocation7 + $0x12c] sm:$0xf0]  ;;  %1112 = vmatpush.bf16.msra.mxu1 %v2069_v49  ;;  %v1909_v28 = vor.u32 %v2624_v55, %v2622_v54  ;;  %v2724_v49 = vld [vmem:[#allocation2 + $0xc0] sm:$0x1]  ;;  %v109_v55 = vadd.f32 %v108_v40, %v2695_v30  ;;  %v177_v40 = vmul.f32 %v2642_v1, %v2642_v1 }
  0x29   :  { %v2630_v59 = vld [vmem:[#allocation2 + $0x8] sm:$0xff]  ;;  %v2634_v61 = vld [vmem:[#allocation2 + $0x18] sm:$0xff]  ;;  %1171 = vmatpush.bf16.msra.mxu3 %v2277_v58  ;;  %1140 = vmatpush.bf16.msra.mxu2 %v2197_v50  ;;  %v2037_v29 = vor.u32 %v2628_v57, %v2626_v56  ;;  %v136_v57 = vadd.f32 %v135_v42, %v2699_v32  ;;  %v179_v42 = vmul.f32 %v2660_v10, %v2660_v10 }
  0x2a   :  { %v2640_v0 = vld [vmem:[#allocation2 + $0x28] sm:$0xff]  ;;  %v147_v2 = vsel %vm146_vm0, %v2634_v61, 0.0  ;;  %v2648_v4 = vld [vmem:[#allocation7 + $0x22c] sm:$0xf0] }
  0x2b   :  { %v2646_v3 = vld [vmem:[#allocation7 + $0x220] sm:$0xf]  ;;  %v2652_v6 = vld [vmem:[#allocation7 + $0xc] sm:$0xf0]  ;;  %v120_v13 = vadd.f32 %v2640_v0, %v2630_v59  ;;  %1085 = vmatpush.bf16.msra.mxu0 %v1925_v62  ;;  %v112_v62 = vsel %vm111_vm1, %v2724_v49, 0.0 }
  0x2c   :  { %v2650_v5 = vld [vmem:[#allocation7] sm:$0xf]  ;;  %v2656_v8 = vld [vmem:[#allocation7 + $0x10c] sm:$0xf0]  ;;  %1113 = vmatpush.bf16.msra.mxu1 %v2053_v15  ;;  %v2165_v44 = vor.u32 %v2648_v4, %v2646_v3  ;;  %v138_v3 = vsel %vm111_vm1, %v2730_v52, 0.0  ;;  %v172_v15 = vmul.f32 %v2630_v59, %v2630_v59 }
  0x2d   :  { %v2654_v7 = vld [vmem:[#allocation7 + $0x100] sm:$0xf]  ;;  %v2658_v9 = vld [vmem:[#allocation2 + $0x38] sm:$0xff]  ;;  %1141 = vmatpush.bf16.msra.mxu2 %v2181_v16  ;;  %v1893_v45 = vor.u32 %v2652_v6, %v2650_v5  ;;  %v110_v5 = vadd.f32 %v109_v55, %v2707_v38 }
  0x2e   :  { %v2662_v11 = vld [vmem:[#allocation2 + $0x48] sm:$0xff]  ;;  %v2676_v18 = vld [vmem:[#allocation2 + $0x58] sm:$0xff]  ;;  %v148_v20 = vsel %vm146_vm0, %v2658_v9, 0.0  ;;  %v2021_v46 = vor.u32 %v2656_v8, %v2654_v7  ;;  %v137_v7 = vadd.f32 %v136_v57, %v2720_v47 }
  0x2f   :  { %v2682_v21 = vld [vmem:[#allocation2 + $0x68] sm:$0xff]  ;;  %v2686_v23 = vld [vmem:[#allocation2 + $0x78] sm:$0xff]  ;;  %v121_v25 = vadd.f32 %v120_v13, %v2662_v11  ;;  %v149_v27 = vadd.f32 %v148_v20, %v147_v2  ;;  %v150_v33 = vsel %vm146_vm0, %v2676_v18, 0.0  ;;  %1086 = vmatpush.bf16.msra.mxu0 %v1909_v28  ;;  %v113_v16 = vadd.f32 %v112_v62, %v110_v5 }
  0x30   :  { %v2697_v31 = vld [vmem:[#allocation2 + $0x88] sm:$0xff]  ;;  %v152_v34 = vsel %vm146_vm0, %v2686_v23, 0.0  ;;  %v2372_v36 = vld [vmem:[#allocation7 + $0x20c] sm:$0xf0]  ;;  %1114 = vmatpush.bf16.msra.mxu1 %v2037_v29  ;;  %v139_v24 = vadd.f32 %v138_v3, %v137_v7  ;;  %v175_v28 = vmul.f32 %v2638_v63, %v2638_v63  ;;  %v176_v29 = vmul.f32 %v2640_v0, %v2640_v0 }
  0x31   :  { %3432 = vst [vmem:[#allocation15_spill] sm:$0xff] %v2697_v31  ;;  %v2148_v35 = vld [vmem:[#allocation7 + $0x200] sm:$0xf]  ;;  %v2705_v37 = vld [vmem:[#allocation2 + $0x98] sm:$0xff]  ;;  %v122_v41 = vadd.f32 %v121_v25, %v2682_v21  ;;  %v151_v43 = vadd.f32 %v150_v33, %v149_v27  ;;  %1142 = vmatpush.bf16.msra.mxu2 %v2165_v44  ;;  %v174_v27 = vmul.f32 %v2634_v61, %v2634_v61  ;;  %v114_v33 = vrot.slane %v113_v16, 4 }
  0x32   :  { %3434 = vst [vmem:[#allocation17_spill] sm:$0xff] %v2705_v37  ;;  %v2709_v39 = vld [vmem:[#allocation2 + $0xa8] sm:$0xff]  ;;  %v2722_v48 = vld [vmem:[#allocation2 + $0xb8] sm:$0xff]  ;;  %v154_v50 = vsel %vm146_vm0, %v2705_v37, 0.0  ;;  %v2149_v12 = vor.u32 %v2372_v36, %v2148_v35  ;;  %v140_v35 = vrot.slane %v139_v24, 4  ;;  %v180_v44 = vmul.f32 %v2662_v11, %v2662_v11 }
  0x33   :  { %3436 = vst [vmem:[#allocation19_spill] sm:$0xff] %v2709_v39  ;;  %v2728_v51 = vld [vmem:[#allocation2 + $0xc8] sm:$0x1]  ;;  %v2732_v54 = vld [vmem:[#allocation2 + $0xd8] sm:$0x1]  ;;  %v123_v56 = vadd.f32 %v122_v41, %v2697_v31  ;;  %v153_v58 = vadd.f32 %v152_v34, %v151_v43  ;;  %v156_v4 = vsel %vm146_vm0, %v2722_v48, 0.0  ;;  %1087 = vmatpush.bf16.msra.mxu0 %v1893_v45  ;;  %v178_v41 = vmul.f32 %v2658_v9, %v2658_v9 }
  0x34   :  { %3437 = vst [vmem:[#allocation20_spill] sm:$0xff] %v2728_v51  ;;  %v125_v2 = vsel %vm111_vm1, %v2728_v51, 0.0  ;;  %v159_v13 = vsel %vm3431_vm2, %v2732_v54, 0.0  ;;  %1115 = vmatpush.bf16.msra.mxu1 %v2021_v46  ;;  %v115_v43 = vadd.f32 %v114_v33, %v113_v16  ;;  %v181_v45 = vmul.f32 %v2674_v17, %v2674_v17 }
  0x35   :  { %v124_v6 = vadd.f32 %v123_v56, %v2709_v39  ;;  %v155_v8 = vadd.f32 %v154_v50, %v153_v58  ;;  %1143 = vmatpush.bf16.msra.mxu2 %v2149_v12  ;;  %v182_v46 = vmul.f32 %v2676_v18, %v2676_v18  ;;  %v183_v50 = vmul.f32 %v2678_v19, %v2678_v19 }
  0x36   :  { %v184_v55 = vmul.f32 %v2682_v21, %v2682_v21  ;;  %v185_v56 = vmul.f32 %v2684_v22, %v2684_v22  ;;  %v186_v57 = vmul.f32 %v2686_v23, %v2686_v23  ;;  %v141_v62 = vadd.f32 %v140_v35, %v139_v24 }
  0x37   :  { %v126_v20 = vadd.f32 %v125_v2, %v124_v6  ;;  %v157_v25 = vadd.f32 %v156_v4, %v155_v8  ;;  %v187_v3 = vmul.f32 %v2695_v30, %v2695_v30  ;;  %v188_v4 = vmul.f32 %v2697_v31, %v2697_v31 }
  0x38   :  { %v189_v5 = vmul.f32 %v2699_v32, %v2699_v32  ;;  %v190_v6 = vmul.f32 %v2705_v37, %v2705_v37  ;;  %v199_v7 = vadd.f32 %v175_v28, %v171_v14  ;;  %v116_v8 = vrot.slane %v115_v43, 2 }
  0x39   :  { %v127_v34 = vrot.slane %v126_v20, 4  ;;  %v160_v36 = vadd.f32 %v159_v13, %v157_v25  ;;  %v191_v12 = vmul.f32 %v2707_v38, %v2707_v38  ;;  %v192_v13 = vmul.f32 %v2709_v39, %v2709_v39 }
  0x3a   :  { %v195_v16 = vmul.f32 %v2724_v49, %v2724_v49  ;;  %v212_v24 = vadd.f32 %v176_v29, %v172_v15  ;;  %v225_v25 = vadd.f32 %v177_v40, %v173_v26  ;;  %v238_v33 = vsel %vm146_vm0, %v174_v27, 0.0 }
  0x3b   :  { %v128_v58 = vadd.f32 %v127_v34, %v126_v20  ;;  %v161_v2 = vrot.slane %v160_v36, 4  ;;  %v200_v20 = vadd.f32 %v199_v7, %v179_v42  ;;  %v142_v35 = vrot.slane %v141_v62, 2 }
  0x3c   :  { %v196_v14 = vmul.f32 %v2728_v51, %v2728_v51  ;;  %v193_v28 = vmul.f32 %v2720_v47, %v2720_v47  ;;  %v213_v31 = vadd.f32 %v212_v24, %v180_v44  ;;  %v226_v39 = vadd.f32 %v225_v25, %v181_v45 }
  0x3d   :  { %v129_v34 = vrot.slane %v128_v58, 2  ;;  %v162_v32 = vadd.f32 %v161_v2, %v160_v36  ;;  %v201_v37 = vadd.f32 %v200_v20, %v183_v50  ;;  %v117_v38 = vadd.f32 %v116_v8, %v115_v43 }
  0x3e   :  { %v194_v42 = vmul.f32 %v2722_v48, %v2722_v48  ;;  %v197_v15 = vmul.f32 %v2730_v52, %v2730_v52  ;;  %v204_v26 = vsel %vm111_vm1, %v195_v16, 0.0  ;;  %v214_v29 = vadd.f32 %v213_v31, %v184_v55 }
  0x3f   :  { %v202_v27 = vadd.f32 %v201_v37, %v187_v3  ;;  %v227_v36 = vadd.f32 %v226_v39, %v185_v56  ;;  %v239_v40 = vsel %vm146_vm0, %v178_v41, 0.0  ;;  %v130_v2 = vadd.f32 %v129_v34, %v128_v58 }
  0x40   :  { %v143_v7 = vadd.f32 %v142_v35, %v141_v62  ;;  %v163_v51 = vrot.slane %v162_v32, 2  ;;  %v217_v44 = vsel %vm111_vm1, %v196_v14, 0.0  ;;  %v215_v43 = vadd.f32 %v214_v29, %v188_v4 }
  0x41   :  { %v203_v45 = vadd.f32 %v202_v27, %v191_v12  ;;  %v228_v50 = vadd.f32 %v227_v36, %v189_v5  ;;  %v240_v8 = vadd.f32 %v239_v40, %v238_v33  ;;  %v118_v20 = vrot.slane %v117_v38, 1 }
  0x42   :  { %v230_v24 = vsel %vm111_vm1, %v197_v15, 0.0  ;;  %v241_v25 = vsel %vm146_vm0, %v182_v46, 0.0  ;;  %v243_v37 = vsel %vm146_vm0, %v186_v57, 0.0  ;;  %v216_v39 = vadd.f32 %v215_v43, %v192_v13 }
  0x43   :  { %v205_v31 = vadd.f32 %v204_v26, %v203_v45  ;;  %v229_v55 = vadd.f32 %v228_v50, %v193_v28  ;;  %v242_v41 = vadd.f32 %v241_v25, %v240_v8  ;;  %v131_v56 = vrot.slane %v130_v2, 1 }
  0x44   :  { %v144_v58 = vrot.slane %v143_v7, 1  ;;  %v198_v62 = vmul.f32 %v2732_v54, %v2732_v54  ;;  %v245_v3 = vsel %vm146_vm0, %v190_v6, 0.0  ;;  %v218_v5 = vadd.f32 %v217_v44, %v216_v39 }
  0x45   :  { %v206_v4 = vrot.slane %v205_v31, 4  ;;  %v231_v12 = vadd.f32 %v230_v24, %v229_v55  ;;  %v244_v16 = vadd.f32 %v243_v37, %v242_v41  ;;  %v119_v33 = vadd.f32 %v118_v20, %v117_v38 }
  0x46   :  { %v164_v34 = vadd.f32 %v163_v51, %v162_v32  ;;  %v247_v46 = vsel %vm146_vm0, %v194_v42, 0.0  ;;  %v219_v35 = vrot.slane %v218_v5, 4  ;;  %v132_v28 = vadd.f32 %v131_v56, %v130_v2 }
  0x47   :  { %v207_v57 = vadd.f32 %v206_v4, %v205_v31  ;;  %v232_v13 = vrot.slane %v231_v12, 4  ;;  %v246_v14 = vadd.f32 %v245_v3, %v244_v16  ;;  %v145_v15 = vadd.f32 %v144_v58, %v143_v7 }
  0x48   :  { %v249_v26 = vsel %vm3431_vm2, %v198_v62, 0.0  ;;  %v220_v29 = vadd.f32 %v219_v35, %v218_v5  ;;  %v165_v40 = vrot.slane %v164_v34, 1  ;;  %v2816_v44 = vmul.f32 0.020408163, %v119_v33 }
  0x49   :  { %v208_v27 = vrot.slane %v207_v57, 2  ;;  %v233_v36 = vadd.f32 %v232_v13, %v231_v12  ;;  %v248_v6 = vadd.f32 %v247_v46, %v246_v14  ;;  %v2818_v42 = vmul.f32 0.020408163, %v132_v28 }
  0x4a   :  { %v221_v38 = vrot.slane %v220_v29, 2  ;;  %v2820_v43 = vmul.f32 0.020408163, %v145_v15  ;;  %v166_v20 = vadd.f32 %v165_v40, %v164_v34  ;;  %v261_v24 = vmul.f32 %v2816_v44, %v2816_v44 }
  0x4b   :  { %v209_v45 = vadd.f32 %v208_v27, %v207_v57  ;;  %v234_v32 = vrot.slane %v233_v36, 2  ;;  %v250_v51 = vadd.f32 %v249_v26, %v248_v6  ;;  %v262_v55 = vmul.f32 %v2818_v42, %v2818_v42 }
  0x4c   :  { %v222_v2 = vadd.f32 %v221_v38, %v220_v29  ;;  %v263_v41 = vmul.f32 %v2820_v43, %v2820_v43  ;;  %v2828_v4 = vmul.f32 0.020408163, %v166_v20 }
  0x4d   :  { %v210_v50 = vrot.slane %v209_v45, 1  ;;  %v235_v7 = vadd.f32 %v234_v32, %v233_v36  ;;  %v251_v8 = vrot.slane %v250_v51, 4 }
  0x4e   :  { %v223_v37 = vrot.slane %v222_v2, 1  ;;  %v264_v13 = vmul.f32 %v2828_v4, %v2828_v4 }
  0x4f   :  { %v211_v25 = vadd.f32 %v210_v50, %v209_v45  ;;  %v236_v31 = vrot.slane %v235_v7, 1  ;;  %v252_v39 = vadd.f32 %v251_v8, %v250_v51 }
  0x50   :  { %v224_v56 = vadd.f32 %v223_v37, %v222_v2 }
  0x51   :  { %v237_v58 = vadd.f32 %v236_v31, %v235_v7  ;;  %v253_v62 = vrot.slane %v252_v39, 2  ;;  %v257_v3 = vmul.f32 0.020408163, %v211_v25 }
  0x52   :  { %v258_v12 = vmul.f32 0.020408163, %v224_v56 }
  0x53   :  { %v254_v5 = vadd.f32 %v253_v62, %v252_v39  ;;  %v259_v16 = vmul.f32 0.020408163, %v237_v58  ;;  %v265_v33 = vsub.f32 %v257_v3, %v261_v24 }
  0x54   :  { %v266_v46 = vsub.f32 %v258_v12, %v262_v55 }
  0x55   :  { %v255_v34 = vrot.slane %v254_v5, 1  ;;  %v267_v57 = vsub.f32 %v259_v16, %v263_v41  ;;  %v269_v35 = vmax.f32 %v265_v33, 0.0 }
  0x56   :  { %v270_v28 = vmax.f32 %v266_v46, 0.0 }
  0x57   :  { %v256_v14 = vadd.f32 %v255_v34, %v254_v5  ;;  %v271_v15 = vmax.f32 %v267_v57, 0.0  ;;  %v274_v26 = vadd.f32 1e-05, %v269_v35  ;;  %v2334_v57 = vld [vmem:[#allocation7 + $0xe4] sm:$0xf] }
  0x58   :  { %v275_v29 = vadd.f32 1e-05, %v270_v28  ;;  %v2006_v35 = vld [vmem:[#allocation7 + $0xf0] sm:$0xf0]  ;;  %v2402_v28 = vld [vmem:[#allocation7 + $0x304] sm:$0xf] }
  0x59   :  { %v260_v27 = vmul.f32 0.020408163, %v256_v14  ;;  %v276_v36 = vadd.f32 1e-05, %v271_v15  ;;  %2415 = vrsqrt.f32 %v274_v26  ;;  %vm284_vm8 = vweird.f32 %v274_v26  ;;  %v2278_v15 = vld [vmem:[#allocation7 + $0x310] sm:$0xf0] }
  0x5a   :  { %2417 = vrsqrt.f32 %v275_v29  ;;  %vm294_vm3 = vweird.f32 %v275_v29  ;;  %v2009_v14 = vor.u32 %v2334_v57, %v2006_v35 }
  0x5b   :  { %v268_v6 = vsub.f32 %v260_v27, %v264_v13  ;;  %2419 = vrsqrt.f32 %v276_v36  ;;  %vm304_vm5 = vweird.f32 %v276_v36 }
  0x5c   :  { %1192 = vmatpush.bf16.msrb.mxu3 %v2009_v14  ;;  %v333_v14 = vld [vmem:[#allocation5 + $0x1] ss:$2 sm:$0xf] }
  0x5d   :  { %v272_v40 = vmax.f32 %v268_v6, 0.0  ;;  %v2281_v6 = vor.u32 %v2402_v28, %v2278_v15  ;;  %v2326_v28 = vld [vmem:[#allocation7 + $0xa4] sm:$0xf] }
  0x5f   :  { %v2832_v45 = vpop.eup %2415  ;;  %v277_v38 = vadd.f32 1e-05, %v272_v40  ;;  %v2366_v40 = vld [vmem:[#allocation7 + $0x1e4] sm:$0xf]  ;;  %1283 = vmatpush.bf16.msrb.mxu2 %v2281_v6 }
  0x60   :  { %v279_v32 = vmul.f32 %v2832_v45, %v274_v26  ;;  %v2418_v51 = vpop.eup %2417  ;;  %vm285_vm9 = vweird.f32 %v2832_v45  ;;  %v2394_v6 = vld [vmem:[#allocation7 + $0x2c4] sm:$0xf] }
  0x61   :  { %2421 = vrsqrt.f32 %v277_v38  ;;  %v2420_v50 = vpop.eup %2419  ;;  %v289_v7 = vmul.f32 %v2418_v51, %v275_v29  ;;  %vm295_vm4 = vweird.f32 %v2418_v51  ;;  %vm314_vm11 = vweird.f32 %v277_v38  ;;  %vm2848_vm13 = vmor %vm284_vm8, %vm285_vm9 }
  0x62   :  { %v280_v2 = vmul.f32 %v2832_v45, %v279_v32  ;;  %v299_v8 = vmul.f32 %v2420_v50, %v276_v36  ;;  %vm305_vm6 = vweird.f32 %v2420_v50  ;;  %vm2836_vm7 = vmor %vm294_vm3, %vm295_vm4  ;;  %vm328_vm3 = vcmask 1041408  }
  0x63   :  { %v290_v24 = vmul.f32 %v2418_v51, %v289_v7  ;;  %vm2841_vm10 = vmor %vm304_vm5, %vm305_vm6  ;;  %v2398_v7 = vld [vmem:[#allocation7 + $0x2e4] sm:$0xf] }
  0x64   :  { %v281_v20 = vmul.f32 0.5, %v280_v2  ;;  %v300_v25 = vmul.f32 %v2420_v50, %v299_v8  ;;  %v1990_v2 = vld [vmem:[#allocation7 + $0xd0] sm:$0xf0] }
  0x65   :  { %v291_v37 = vmul.f32 0.5, %v290_v24  ;;  %v2262_v24 = vld [vmem:[#allocation7 + $0x2f0] sm:$0xf0] }
  0x66   :  { %v301_v39 = vmul.f32 0.5, %v300_v25  ;;  %v282_v55 = vsub.f32 1.5, %v281_v20  ;;  %v2362_v25 = vld [vmem:[#allocation7 + $0x1c4] sm:$0xf] }
  0x67   :  { %v2422_v31 = vpop.eup %2421  ;;  %v292_v41 = vsub.f32 1.5, %v291_v37  ;;  %v2118_v37 = vld [vmem:[#allocation7 + $0x1d0] sm:$0xf0] }
  0x68   :  { %v309_v56 = vmul.f32 %v2422_v31, %v277_v38  ;;  %v302_v62 = vsub.f32 1.5, %v301_v39  ;;  %vm315_vm12 = vweird.f32 %v2422_v31  ;;  %v283_v33 = vmul.f32 %v2832_v45, %v282_v55  ;;  %v2134_v38 = vld [vmem:[#allocation7 + $0x1f0] sm:$0xf0] }
  0x69   :  { %v293_v3 = vmul.f32 %v2418_v51, %v292_v41  ;;  %vm2854_vm14 = vmor %vm314_vm11, %vm315_vm12  ;;  %v2137_v32 = vor.u32 %v2366_v40, %v2134_v38  ;;  %v2265_v55 = vor.u32 %v2398_v7, %v2262_v24  ;;  %v2121_v41 = vor.u32 %v2362_v25, %v2118_v37  ;;  %v2246_v40 = vld [vmem:[#allocation7 + $0x2d0] sm:$0xf0]  ;;  %v2358_v38 = vld [vmem:[#allocation7 + $0x1a4] sm:$0xf] }
  0x6a   :  { %v310_v5 = vmul.f32 %v2422_v31, %v309_v56  ;;  %v303_v12 = vmul.f32 %v2420_v50, %v302_v62  ;;  %v287_v8 = vsel %vm2848_vm13, %v2832_v45, %v283_v33  ;;  %v273_v45 = vld [vmem:[#allocation5] ss:$2 sm:$0xf]  ;;  %v1958_v7 = vld [vmem:[#allocation7 + $0x90] sm:$0xf0] }
  0x6b   :  { %v297_v34 = vsel %vm2836_vm7, %v2418_v51, %v293_v3  ;;  %v2330_v51 = vld [vmem:[#allocation7 + $0xc4] sm:$0xf]  ;;  %1220 = vmatpush.bf16.msrb.mxu0 %v2137_v32  ;;  %1248 = vmatpush.bf16.msrb.mxu1 %v2265_v55  ;;  %v2230_v37 = vld [vmem:[#allocation7 + $0x2b0] sm:$0xf0] }
  0x6c   :  { %v311_v46 = vmul.f32 0.5, %v310_v5  ;;  %v307_v26 = vsel %vm2841_vm10, %v2420_v50, %v303_v12  ;;  %v322_v36 = vrot.slane %v297_v34, 7  ;;  %v1993_v50 = vor.u32 %v2330_v51, %v1990_v2  ;;  %v2322_v2 = vld [vmem:[#allocation7 + $0x84] sm:$0xf]  ;;  %v2086_v55 = vld [vmem:[#allocation7 + $0x190] sm:$0xf0] }
  0x6d   :  { %v323_v39 = vrot.slane %v307_v26, 6 }
  0x6e   :  { %v312_v27 = vsub.f32 1.5, %v311_v46  ;;  %v325_v62 = vsel %vm111_vm1, %v287_v8, %v322_v36  ;;  %1193 = vmatpush.bf16.msrb.mxu3 %v1993_v50  ;;  %v1974_v36 = vld [vmem:[#allocation7 + $0xb0] sm:$0xf0]  ;;  %v2390_v50 = vld [vmem:[#allocation7 + $0x2a4] sm:$0xf] }
  0x6f   :  { %1221 = vmatpush.bf16.msrb.mxu0 %v2121_v41  ;;  %v1977_v25 = vor.u32 %v2326_v28, %v1974_v36  ;;  %v2249_v41 = vor.u32 %v2394_v6, %v2246_v40 }
  0x70   :  { %v313_v20 = vmul.f32 %v2422_v31, %v312_v27 }
  0x71   :  { %1249 = vmatpush.bf16.msrb.mxu1 %v2249_v41  ;;  %v2314_v41 = vld [vmem:[#allocation7 + $0x44] sm:$0xf] }
  0x72   :  { %v317_v56 = vsel %vm2854_vm14, %v2422_v31, %v313_v20  ;;  %1194 = vmatpush.bf16.msrb.mxu3 %v1977_v25  ;;  %v2386_v25 = vld [vmem:[#allocation7 + $0x284] sm:$0xf] }
  0x73   :  { %v324_v58 = vrot.slane %v317_v56, 5  ;;  %v1961_v56 = vor.u32 %v2322_v2, %v1958_v7 }
  0x75   :  { %v327_v3 = vsel %vm326_vm15, %v323_v39, %v324_v58  ;;  %v2354_v39 = vld [vmem:[#allocation7 + $0x184] sm:$0xf] }
  0x76   :  { %v329_v5 = vsel %vm328_vm3, %v325_v62, %v327_v3  ;;  %v2089_v3 = vor.u32 %v2354_v39, %v2086_v55  ;;  %1195 = vmatpush.bf16.msrb.mxu3 %v1961_v56  ;;  %v2350_v39 = vld [vmem:[#allocation7 + $0x164] sm:$0xf]  ;;  %v2070_v55 = vld [vmem:[#allocation7 + $0x170] sm:$0xf0] }
  0x77   :  { %v331_v12 = vmul.f32 %v329_v5, %v273_v45  ;;  %v2233_v45 = vor.u32 %v2390_v50, %v2230_v37  ;;  %v1942_v50 = vld [vmem:[#allocation7 + $0x70] sm:$0xf0] }
  0x78   :  { %v2214_v37 = vld [vmem:[#allocation7 + $0x290] sm:$0xf0] }
  0x79   :  { %v2866_v16 = vperm.slane %v331_v12, 0  ;;  %v2868_v33 = vperm.slane %v331_v12, 1  ;;  %v2870_v34 = vperm.slane %v331_v12, 2  ;;  %v2872_v31 = vperm.slane %v331_v12, 3  ;;  %1250 = vmatpush.bf16.msrb.mxu1 %v2233_v45  ;;  %v2198_v56 = vld [vmem:[#allocation7 + $0x270] sm:$0xf0] }
  0x7a   :  { %v2054_v45 = vld [vmem:[#allocation7 + $0x150] sm:$0xf0] }
  0x7b   :  { %v343_v46 = vmul.f32 %v2866_v16, %v2816_v44  ;;  %v344_v57 = vmul.f32 %v2868_v33, %v2818_v42  ;;  %v345_v35 = vmul.f32 %v2870_v34, %v2820_v43  ;;  %v346_v13 = vmul.f32 %v2872_v31, %v2828_v4 }
  0x7c   :  { %v359_v29 = vmul.f32 %v2866_v16, %v2620_v53  ;;  %v363_v44 = vmul.f32 %v2866_v16, %v2638_v63  ;;  %v360_v42 = vmul.f32 %v2868_v33, %v2630_v59  ;;  %v364_v43 = vmul.f32 %v2868_v33, %v2640_v0  ;;  %v2102_v59 = vld [vmem:[#allocation7 + $0x1b0] sm:$0xf0] }
  0x7d   :  { %v351_v15 = vrot.slane %v344_v57, 7  ;;  %v352_v26 = vrot.slane %v345_v35, 6  ;;  %v353_v27 = vrot.slane %v346_v13, 5  ;;  %v361_v4 = vmul.f32 %v2870_v34, %v2632_v60 }
  0x7e   :  { %v365_v51 = vmul.f32 %v2870_v34, %v2642_v1  ;;  %v362_v63 = vmul.f32 %v2872_v31, %v2634_v61  ;;  %v366_v60 = vmul.f32 %v2872_v31, %v2658_v9  ;;  %v367_v8 = vmul.f32 %v2866_v16, %v2660_v10 }
  0x7f   :  { %v354_v32 = vsel %vm111_vm1, %v343_v46, %v351_v15  ;;  %v355_v53 = vsel %vm326_vm15, %v352_v26, %v353_v27  ;;  %v371_v20 = vmul.f32 %v2866_v16, %v2678_v19  ;;  %v368_v1 = vmul.f32 %v2868_v33, %v2662_v11 }
  0x80   :  { %v356_v0 = vsel %vm328_vm3, %v354_v32, %v355_v53  ;;  %v372_v61 = vmul.f32 %v2868_v33, %v2682_v21  ;;  %v369_v9 = vmul.f32 %v2870_v34, %v2674_v17  ;;  %v2105_v10 = vor.u32 %v2358_v38, %v2102_v59 }
  0x81   :  { %v358_v24 = vsub.f32 %v333_v14, %v356_v0  ;;  %v373_v21 = vmul.f32 %v2870_v34, %v2684_v22  ;;  %v374_v2 = vmul.f32 %v2872_v31, %v2686_v23  ;;  %v2382_v23 = vld [vmem:[#allocation7 + $0x264] sm:$0xf] }
  0x82   :  { %1222 = vmatpush.bf16.msrb.mxu0 %v2105_v10  ;;  %v1926_v10 = vld [vmem:[#allocation7 + $0x50] sm:$0xf0] }
  0x83   :  { %v2911_v58 = vperm.slane %v358_v24, 0  ;;  %v2913_v19 = vperm.slane %v358_v24, 1  ;;  %v2915_v62 = vperm.slane %v358_v24, 2  ;;  %v2917_v11 = vperm.slane %v358_v24, 3 }
  0x85   :  { %v396_v17 = vadd.f32 %v2911_v58, %v359_v29  ;;  %v400_v5 = vadd.f32 %v2911_v58, %v363_v44  ;;  %v397_v12 = vadd.f32 %v2913_v19, %v360_v42  ;;  %v401_v46 = vadd.f32 %v2913_v19, %v364_v43 }
  0x86   :  { %v398_v57 = vadd.f32 %v2915_v62, %v361_v4  ;;  %v402_v35 = vadd.f32 %v2915_v62, %v365_v51  ;;  %v399_v13 = vadd.f32 %v2917_v11, %v362_v63  ;;  %v403_v22 = vadd.f32 %v2917_v11, %v366_v60  ;;  %1223 = vmatpush.bf16.msrb.mxu0 %v2089_v3 }
  0x87   :  { %v424_v14 = vmax.f32 %v396_v17, 0.0  ;;  %v428_v28 = vmax.f32 %v400_v5, 0.0  ;;  %v425_v15 = vmax.f32 %v397_v12, 0.0  ;;  %v429_v26 = vmax.f32 %v401_v46, 0.0 }
  0x88   :  { %v426_v27 = vmax.f32 %v398_v57, 0.0  ;;  %v430_v29 = vmax.f32 %v402_v35, 0.0  ;;  %v427_v36 = vmax.f32 %v399_v13, 0.0  ;;  %v431_v44 = vmax.f32 %v403_v22, 0.0 }
  0x89   :  { %v2929_v42 = vpack.c.bf16 %v428_v28, %v424_v14  ;;  %v2931_v43 = vpack.c.bf16 %v429_v26, %v425_v15  ;;  %v404_v40 = vadd.f32 %v2911_v58, %v367_v8  ;;  %v408_v38 = vadd.f32 %v2911_v58, %v371_v20  ;;  %v2318_v20 = vld [vmem:[#allocation7 + $0x64] sm:$0xf] }
  0x8a   :  { %v2933_v4 = vpack.c.bf16 %v430_v29, %v426_v27  ;;  %v2935_v6 = vpack.c.bf16 %v431_v44, %v427_v36  ;;  %v405_v32 = vadd.f32 %v2913_v19, %v368_v1  ;;  %v409_v53 = vadd.f32 %v2913_v19, %v372_v61  ;;  %v3446_v26 = vld [vmem:[#allocation18_spill] sm:$0xff]  ;;  %v3447_v29 = vld [vmem:[#allocation15_spill] sm:$0xff] }
  0x8b   :  { %1088 = vmatmul.bf16.vlgmr.msra.gmra.mxu0 %v2929_v42  ;;  %1116 = vmatmul.bf16.vlgmr.msra.gmra.mxu1 %v2931_v43  ;;  %v370_v51 = vmul.f32 %v2872_v31, %v2676_v18  ;;  %v406_v63 = vadd.f32 %v2915_v62, %v369_v9  ;;  %v410_v59 = vadd.f32 %v2915_v62, %v373_v21  ;;  %v432_v7 = vmax.f32 %v404_v40, 0.0  ;;  %v2346_v21 = vld [vmem:[#allocation7 + $0x144] sm:$0xf]  ;;  %v3448_v44 = vld [vmem:[#allocation19_spill] sm:$0xff] }
  0x8c   :  { %1144 = vmatmul.bf16.vlgmr.msra.gmra.mxu2 %v2933_v4  ;;  %2290 = vmatmul.msk.bf16.vlgmr.msra.gmra.mxu3 %vm146_vm0, %v2935_v6  ;;  %v436_v0 = vmax.f32 %v408_v38, 0.0  ;;  %v433_v60 = vmax.f32 %v405_v32, 0.0  ;;  %v437_v8 = vmax.f32 %v409_v53, 0.0  ;;  %v411_v61 = vadd.f32 %v2917_v11, %v374_v2  ;;  %v3449_v38 = vld [vmem:[#allocation16_spill] sm:$0xff]  ;;  %v3450_v53 = vld [vmem:[#allocation17_spill] sm:$0xff] }
  0x8d   :  { %v434_v24 = vmax.f32 %v406_v63, 0.0  ;;  %v438_v18 = vmax.f32 %v410_v59, 0.0  ;;  %v407_v1 = vadd.f32 %v2917_v11, %v370_v51  ;;  %v1945_v9 = vor.u32 %v2318_v20, %v1942_v50  ;;  %v2310_v59 = vld [vmem:[#allocation7 + $0x24] sm:$0xf]  ;;  %v1910_v2 = vld [vmem:[#allocation7 + $0x30] sm:$0xf0] }
  0x8e   :  { %v439_v17 = vmax.f32 %v411_v61, 0.0  ;;  %v2217_v5 = vor.u32 %v2386_v25, %v2214_v37  ;;  %v2073_v12 = vor.u32 %v2350_v39, %v2070_v55  ;;  %v1929_v46 = vor.u32 %v2314_v41, %v1926_v10  ;;  %v1894_v61 = vld [vmem:[#allocation7 + $0x10] sm:$0xf0]  ;;  %v2374_v55 = vld [vmem:[#allocation7 + $0x224] sm:$0xf] }
  0x8f   :  { %v435_v3 = vmax.f32 %v407_v1, 0.0  ;;  %1196 = vmatpush.bf16.msrb.mxu3 %v1945_v9  ;;  %v2201_v57 = vor.u32 %v2382_v23, %v2198_v56  ;;  %v2057_v35 = vor.u32 %v2346_v21, %v2054_v45  ;;  %v2954_v13 = vpack.c.bf16 %v436_v0, %v432_v7  ;;  %v2378_v0 = vld [vmem:[#allocation7 + $0x244] sm:$0xf]  ;;  %v2166_v9 = vld [vmem:[#allocation7 + $0x230] sm:$0xf0] }
  0x90   :  { %1251 = vmatpush.bf16.msrb.mxu1 %v2217_v5  ;;  %1224 = vmatpush.bf16.msrb.mxu0 %v2073_v12  ;;  %v2956_v22 = vpack.c.bf16 %v437_v8, %v433_v60  ;;  %v2958_v14 = vpack.c.bf16 %v438_v18, %v434_v24  ;;  %v375_v15 = vmul.f32 %v2866_v16, %v2695_v30  ;;  %v2182_v60 = vld [vmem:[#allocation7 + $0x250] sm:$0xf0]  ;;  %v2342_v8 = vld [vmem:[#allocation7 + $0x124] sm:$0xf] }
  0x91   :  { %v2960_v28 = vpack.c.bf16 %v439_v17, %v435_v3  ;;  %v379_v27 = vmul.f32 %v2866_v16, %v3446_v26  ;;  %v376_v36 = vmul.f32 %v2868_v33, %v3447_v29  ;;  %v380_v40 = vmul.f32 %v2868_v33, %v3448_v44  ;;  %v2306_v1 = vld [vmem:[#allocation7 + $0x4] sm:$0xf]  ;;  %v2022_v45 = vld [vmem:[#allocation7 + $0x110] sm:$0xf0] }
  0x92   :  { %v377_v32 = vmul.f32 %v2870_v34, %v3449_v38  ;;  %v381_v30 = vmul.f32 %v2870_v34, %v2720_v47  ;;  %v378_v51 = vmul.f32 %v2872_v31, %v3450_v53  ;;  %v382_v63 = vmul.f32 %v2872_v31, %v2722_v48  ;;  %v2038_v47 = vld [vmem:[#allocation7 + $0x130] sm:$0xf0]  ;;  %v2338_v41 = vld [vmem:[#allocation7 + $0x104] sm:$0xf] }
  0x93   :  { %1197 = vmatpush.bf16.msrb.mxu3 %v1929_v46  ;;  %v1913_v7 = vor.u32 %v2310_v59, %v1910_v2  ;;  %v412_v20 = vadd.f32 %v2911_v58, %v375_v15  ;;  %v416_v50 = vadd.f32 %v2911_v58, %v379_v27  ;;  %v413_v24 = vadd.f32 %v2913_v19, %v376_v36  ;;  %v2370_v17 = vld [vmem:[#allocation7 + $0x204] sm:$0xf]  ;;  %v2150_v5 = vld [vmem:[#allocation7 + $0x210] sm:$0xf0]  ;;  %v2012_v2 = vld [vmem:[#allocation7 + $0xe8] sm:$0xf] }
  0x94   :  { %1252 = vmatpush.bf16.msrb.mxu1 %v2201_v57  ;;  %1225 = vmatpush.bf16.msrb.mxu0 %v2057_v35  ;;  %v2185_v18 = vor.u32 %v2378_v0, %v2182_v60  ;;  %v417_v25 = vadd.f32 %v2913_v19, %v380_v40  ;;  %v414_v48 = vadd.f32 %v2915_v62, %v377_v32  ;;  %v3451_v53 = vld [vmem:[#allocation20_spill] sm:$0xff]  ;;  %v2284_v0 = vld [vmem:[#allocation7 + $0x308] sm:$0xf] }
  0x95   :  { %v2041_v37 = vor.u32 %v2342_v8, %v2038_v47  ;;  %v1897_v39 = vor.u32 %v2306_v1, %v1894_v61  ;;  %v418_v10 = vadd.f32 %v2915_v62, %v381_v30  ;;  %v415_v23 = vadd.f32 %v2917_v11, %v378_v51  ;;  %v2405_v8 = vld [vmem:[#allocation7 + $0x314] sm:$0xf0]  ;;  %v2124_v1 = vld [vmem:[#allocation7 + $0x1c8] sm:$0xf] }
  0x96   :  { %v419_v56 = vadd.f32 %v2917_v11, %v382_v63  ;;  %v2169_v21 = vor.u32 %v2374_v55, %v2166_v9  ;;  %v2025_v3 = vor.u32 %v2338_v41, %v2022_v45  ;;  %v440_v12 = vmax.f32 %v412_v20, 0.0  ;;  %v2365_v61 = vld [vmem:[#allocation7 + $0x1d4] sm:$0xf0] }
  0x97   :  { %1198 = vmatpush.bf16.msrb.mxu3 %v1913_v7  ;;  %v444_v46 = vmax.f32 %v416_v50, 0.0  ;;  %v441_v57 = vmax.f32 %v413_v24, 0.0  ;;  %v445_v35 = vmax.f32 %v417_v25, 0.0  ;;  %v442_v15 = vmax.f32 %v414_v48, 0.0  ;;  %v2337_v7 = vld [vmem:[#allocation7 + $0xf4] sm:$0xf0] }
  0x98   :  { %1253 = vmatpush.bf16.msrb.mxu1 %v2185_v18  ;;  %1226 = vmatpush.bf16.msrb.mxu0 %v2041_v37  ;;  %v446_v26 = vmax.f32 %v418_v10, 0.0  ;;  %v443_v27 = vmax.f32 %v415_v23, 0.0  ;;  %v447_v29 = vmax.f32 %v419_v56, 0.0  ;;  %v2153_v36 = vor.u32 %v2370_v17, %v2150_v5  ;;  %v1996_v50 = vld [vmem:[#allocation7 + $0xc8] sm:$0xf] }
  0x99   :  { %v2991_v44 = vpack.c.bf16 %v444_v46, %v440_v12  ;;  %v2993_v40 = vpack.c.bf16 %v445_v35, %v441_v57  ;;  %v383_v30 = vmul.f32 %v2866_v16, %v2724_v49  ;;  %v384_v51 = vmul.f32 %v2868_v33, %v3451_v53  ;;  %v2140_v49 = vld [vmem:[#allocation7 + $0x1e8] sm:$0xf]  ;;  %v2369_v16 = vld [vmem:[#allocation7 + $0x1f4] sm:$0xf0] }
  0x9a   :  { %v2995_v38 = vpack.c.bf16 %v446_v26, %v442_v15  ;;  %v2997_v32 = vpack.c.bf16 %v447_v29, %v443_v27  ;;  %v385_v63 = vmul.f32 %v2870_v34, %v2730_v52  ;;  %v386_v59 = vmul.f32 %v2872_v31, %v2732_v54  ;;  %v2333_v24 = vld [vmem:[#allocation7 + $0xd4] sm:$0xf0]  ;;  %v2268_v52 = vld [vmem:[#allocation7 + $0x2e8] sm:$0xf] }
  0x9b   :  { %1093 = vmatmul.bf16.gmra.mxu0 %v2954_v13  ;;  %1121 = vmatmul.bf16.gmra.mxu1 %v2956_v22  ;;  %v2013_v60 = vor.u32 %v2337_v7, %v2012_v2  ;;  %v2285_v20 = vor.u32 %v2405_v8, %v2284_v0  ;;  %v2141_v33 = vor.u32 %v2369_v16, %v2140_v49  ;;  %v2401_v31 = vld [vmem:[#allocation7 + $0x2f4] sm:$0xf0]  ;;  %v2252_v56 = vld [vmem:[#allocation7 + $0x2c8] sm:$0xf] }
  0x9c   :  { %1149 = vmatmul.bf16.gmra.mxu2 %v2958_v14  ;;  %2291 = vmatmul.msk.bf16.gmra.mxu3 %vm146_vm0, %v2960_v28  ;;  %v420_v34 = vadd.f32 %v2911_v58, %v383_v30  ;;  %v421_v18 = vadd.f32 %v2913_v19, %v384_v51  ;;  %v422_v47 = vadd.f32 %v2915_v62, %v385_v63  ;;  %v2329_v23 = vld [vmem:[#allocation7 + $0xb4] sm:$0xf0]  ;;  %v1964_v46 = vld [vmem:[#allocation7 + $0x88] sm:$0xf] }
  0x9d   :  { %1199 = vmatpush.bf16.msrb.mxu3 %v1897_v39  ;;  %1254 = vmatpush.bf16.msrb.mxu1 %v2169_v21  ;;  %v1997_v54 = vor.u32 %v2333_v24, %v1996_v50  ;;  %v423_v25 = vadd.f32 %v2917_v11, %v386_v59  ;;  %v2269_v48 = vor.u32 %v2401_v31, %v2268_v52  ;;  %v1980_v11 = vld [vmem:[#allocation7 + $0xa8] sm:$0xf]  ;;  %v2397_v45 = vld [vmem:[#allocation7 + $0x2d4] sm:$0xf0] }
  0x9e   :  { %1227 = vmatpush.bf16.msrb.mxu0 %v2025_v3  ;;  %1395 = vmatpush.bf16.msra.mxu2 %v2285_v20  ;;  %v2125_v37 = vor.u32 %v2365_v61, %v2124_v1  ;;  %v448_v39 = vmax.f32 %v420_v34, 0.0  ;;  %v449_v55 = vmax.f32 %v421_v18, 0.0  ;;  %v450_v58 = vmax.f32 %v422_v47, 0.0  ;;  %v2108_v3 = vld [vmem:[#allocation7 + $0x1a8] sm:$0xf] }
  0x9f   :  { %v451_v9 = vmax.f32 %v423_v25, 0.0  ;;  %v1981_v21 = vor.u32 %v2329_v23, %v1980_v11  ;;  %v2361_v17 = vld [vmem:[#allocation7 + $0x1b4] sm:$0xf0]  ;;  %v2253_v5 = vor.u32 %v2397_v45, %v2252_v56  ;;  %v2236_v35 = vld [vmem:[#allocation7 + $0x2a8] sm:$0xf] }
  0xa0   :  { %v3016_v19 = vpack.c.bf16 %v448_v39, %v448_v39  ;;  %v3018_v62 = vpack.c.bf16 %v449_v55, %v449_v55  ;;  %v3020_v41 = vpack.c.bf16 %v450_v58, %v450_v58  ;;  %v2109_v12 = vor.u32 %v2361_v17, %v2108_v3  ;;  %v2325_v57 = vld [vmem:[#allocation7 + $0x94] sm:$0xf0]  ;;  %v2092_v27 = vld [vmem:[#allocation7 + $0x188] sm:$0xf] }
  0xa1   :  { %1255 = vmatpush.bf16.msrb.mxu1 %v2153_v36  ;;  %1304 = vmatpush.bf16.msra.mxu3 %v2013_v60  ;;  %v3022_v10 = vpack.c.bf16 %v451_v9, %v451_v9  ;;  %v1965_v15 = vor.u32 %v2325_v57, %v1964_v46  ;;  %v2393_v26 = vld [vmem:[#allocation7 + $0x2b4] sm:$0xf0]  ;;  %v1948_v53 = vld [vmem:[#allocation7 + $0x68] sm:$0xf]  ;;  %v2335_v46 = vld [vmem:[#allocation7 + $0xec] sm:$0xf] }
  0xa2   :  { %1332 = vmatpush.bf16.msra.mxu0 %v2141_v33  ;;  %v2357_v29 = vld [vmem:[#allocation7 + $0x194] sm:$0xf0]  ;;  %v2237_v36 = vor.u32 %v2393_v26, %v2236_v35  ;;  %v2220_v63 = vld [vmem:[#allocation7 + $0x288] sm:$0xf]  ;;  %v2014_v57 = vld [vmem:[#allocation7 + $0xf8] sm:$0xf0] }
  0xa3   :  { %v2093_v30 = vor.u32 %v2357_v29, %v2092_v27  ;;  %v2321_v51 = vld [vmem:[#allocation7 + $0x74] sm:$0xf0]  ;;  %v2076_v7 = vld [vmem:[#allocation7 + $0x168] sm:$0xf]  ;;  %v2017_v35 = vor.u32 %v2335_v46, %v2014_v57  ;;  %v2286_v26 = vld [vmem:[#allocation7 + $0x318] sm:$0xf0] }
  0xa4   :  { %v1949_v59 = vor.u32 %v2321_v51, %v1948_v53  ;;  %v2389_v2 = vld [vmem:[#allocation7 + $0x294] sm:$0xf0]  ;;  %v1932_v49 = vld [vmem:[#allocation7 + $0x48] sm:$0xf]  ;;  %v2367_v27 = vld [vmem:[#allocation7 + $0x1ec] sm:$0xf] }
  0xa5   :  { %1360 = vmatpush.bf16.msra.mxu1 %v2269_v48  ;;  %1305 = vmatpush.bf16.msra.mxu3 %v1997_v54  ;;  %v2353_v0 = vld [vmem:[#allocation7 + $0x174] sm:$0xf0]  ;;  %v2221_v60 = vor.u32 %v2389_v2, %v2220_v63  ;;  %v2204_v20 = vld [vmem:[#allocation7 + $0x268] sm:$0xf]  ;;  %v1998_v53 = vld [vmem:[#allocation7 + $0xd8] sm:$0xf0] }
  0xa6   :  { %1333 = vmatpush.bf16.msra.mxu0 %v2125_v37  ;;  %v2077_v8 = vor.u32 %v2353_v0, %v2076_v7  ;;  %v2317_v16 = vld [vmem:[#allocation7 + $0x54] sm:$0xf0]  ;;  %v2060_v24 = vld [vmem:[#allocation7 + $0x148] sm:$0xf]  ;;  %v2270_v2 = vld [vmem:[#allocation7 + $0x2f8] sm:$0xf0] }
  0xa7   :  { %v1933_v33 = vor.u32 %v2317_v16, %v1932_v49  ;;  %v2385_v50 = vld [vmem:[#allocation7 + $0x274] sm:$0xf0]  ;;  %v1916_v47 = vld [vmem:[#allocation7 + $0x28] sm:$0xf]  ;;  %v2363_v0 = vld [vmem:[#allocation7 + $0x1cc] sm:$0xf] }
  0xa8   :  { %v2349_v52 = vld [vmem:[#allocation7 + $0x154] sm:$0xf0]  ;;  %v2205_v34 = vor.u32 %v2385_v50, %v2204_v20  ;;  %v2188_v31 = vld [vmem:[#allocation7 + $0x248] sm:$0xf]  ;;  %v1982_v16 = vld [vmem:[#allocation7 + $0xb8] sm:$0xf0] }
  0xa9   :  { %1306 = vmatpush.bf16.msra.mxu3 %v1981_v21  ;;  %1361 = vmatpush.bf16.msra.mxu1 %v2253_v5  ;;  %v2061_v18 = vor.u32 %v2349_v52, %v2060_v24  ;;  %v2313_v54 = vld [vmem:[#allocation7 + $0x34] sm:$0xf0]  ;;  %v2044_v25 = vld [vmem:[#allocation7 + $0x128] sm:$0xf]  ;;  %v2395_v20 = vld [vmem:[#allocation7 + $0x2cc] sm:$0xf] }
  0xaa   :  { %1334 = vmatpush.bf16.msra.mxu0 %v2109_v12  ;;  %v1917_v1 = vor.u32 %v2313_v54, %v1916_v47  ;;  %v2381_v61 = vld [vmem:[#allocation7 + $0x254] sm:$0xf0]  ;;  %v1900_v55 = vld [vmem:[#allocation7 + $0x8] sm:$0xf]  ;;  %v2359_v52 = vld [vmem:[#allocation7 + $0x1ac] sm:$0xf] }
  0xab   :  { %1098 = vmatmul.bf16.gmra.mxu0 %v2991_v44  ;;  %1126 = vmatmul.bf16.gmra.mxu1 %v2993_v40  ;;  %v2345_v48 = vld [vmem:[#allocation7 + $0x134] sm:$0xf0]  ;;  %v2189_v37 = vor.u32 %v2381_v61, %v2188_v31  ;;  %v2172_v9 = vld [vmem:[#allocation7 + $0x228] sm:$0xf]  ;;  %v1966_v54 = vld [vmem:[#allocation7 + $0x98] sm:$0xf0] }
  0xac   :  { %1154 = vmatmul.bf16.gmra.mxu2 %v2995_v38  ;;  %2292 = vmatmul.msk.bf16.gmra.mxu3 %vm146_vm0, %v2997_v32  ;;  %v2045_v39 = vor.u32 %v2345_v48, %v2044_v25  ;;  %v2309_v58 = vld [vmem:[#allocation7 + $0x14] sm:$0xf0]  ;;  %v2028_v21 = vld [vmem:[#allocation7 + $0x108] sm:$0xf]  ;;  %v2391_v31 = vld [vmem:[#allocation7 + $0x2ac] sm:$0xf] }
  0xad   :  { %1307 = vmatpush.bf16.msra.mxu3 %v1965_v15  ;;  %1362 = vmatpush.bf16.msra.mxu1 %v2237_v36  ;;  %v1901_v11 = vor.u32 %v2309_v58, %v1900_v55  ;;  %v2377_v23 = vld [vmem:[#allocation7 + $0x234] sm:$0xf0]  ;;  %v2156_v3 = vld [vmem:[#allocation7 + $0x208] sm:$0xf]  ;;  %v2403_v15 = vld [vmem:[#allocation7 + $0x30c] sm:$0xf] }
  0xae   :  { %1335 = vmatpush.bf16.msra.mxu0 %v2093_v30  ;;  %v2173_v56 = vor.u32 %v2377_v23, %v2172_v9  ;;  %v2341_v45 = vld [vmem:[#allocation7 + $0x114] sm:$0xf0]  ;;  %v2289_v29 = vor.u32 %v2403_v15, %v2286_v26  ;;  %v2142_v36 = vld [vmem:[#allocation7 + $0x1f8] sm:$0xf0]  ;;  %v2331_v30 = vld [vmem:[#allocation7 + $0xcc] sm:$0xf] }
  0xaf   :  { %v2029_v17 = vor.u32 %v2341_v45, %v2028_v21  ;;  %v2373_v5 = vld [vmem:[#allocation7 + $0x214] sm:$0xf0]  ;;  %v2145_v51 = vor.u32 %v2367_v27, %v2142_v36  ;;  %v2001_v63 = vor.u32 %v2331_v30, %v1998_v53  ;;  %v2355_v55 = vld [vmem:[#allocation7 + $0x18c] sm:$0xf]  ;;  %v2094_v58 = vld [vmem:[#allocation7 + $0x198] sm:$0xf0] }
  0xb0   :  { %v2157_v12 = vor.u32 %v2373_v5, %v2156_v3  ;;  %v2319_v9 = vld [vmem:[#allocation7 + $0x6c] sm:$0xf]  ;;  %v1950_v21 = vld [vmem:[#allocation7 + $0x78] sm:$0xf0] }
  0xb1   :  { %1308 = vmatpush.bf16.msra.mxu3 %v1949_v59  ;;  %1363 = vmatpush.bf16.msra.mxu1 %v2221_v60  ;;  %v2399_v59 = vld [vmem:[#allocation7 + $0x2ec] sm:$0xf]  ;;  %v2126_v60 = vld [vmem:[#allocation7 + $0x1d8] sm:$0xf0]  ;;  %v1953_v46 = vor.u32 %v2319_v9, %v1950_v21 }
  0xb2   :  { %1336 = vmatpush.bf16.msra.mxu0 %v2077_v8  ;;  %v2273_v7 = vor.u32 %v2399_v59, %v2270_v2  ;;  %v2327_v8 = vld [vmem:[#allocation7 + $0xac] sm:$0xf]  ;;  %v2129_v49 = vor.u32 %v2363_v0, %v2126_v60  ;;  %v2222_v3 = vld [vmem:[#allocation7 + $0x298] sm:$0xf0] }
  0xb3   :  { %v1985_v50 = vor.u32 %v2327_v8, %v1982_v16  ;;  %v2387_v45 = vld [vmem:[#allocation7 + $0x28c] sm:$0xf]  ;;  %v2078_v27 = vld [vmem:[#allocation7 + $0x178] sm:$0xf0] }
  0xb4   :  { %v2225_v57 = vor.u32 %v2387_v45, %v2222_v3  ;;  %v2351_v26 = vld [vmem:[#allocation7 + $0x16c] sm:$0xf]  ;;  %v2206_v59 = vld [vmem:[#allocation7 + $0x278] sm:$0xf0] }
  0xb5   :  { %1309 = vmatpush.bf16.msra.mxu3 %v1933_v33  ;;  %1364 = vmatpush.bf16.msra.mxu1 %v2205_v34  ;;  %v2254_v33 = vld [vmem:[#allocation7 + $0x2d8] sm:$0xf0]  ;;  %v2081_v53 = vor.u32 %v2351_v26, %v2078_v27  ;;  %v2375_v9 = vld [vmem:[#allocation7 + $0x22c] sm:$0xf] }
  0xb6   :  { %1337 = vmatpush.bf16.msra.mxu0 %v2061_v18  ;;  %v2257_v24 = vor.u32 %v2395_v20, %v2254_v33  ;;  %v2110_v34 = vld [vmem:[#allocation7 + $0x1b8] sm:$0xf0]  ;;  %v2323_v18 = vld [vmem:[#allocation7 + $0x8c] sm:$0xf] }
  0xb7   :  { %v2113_v47 = vor.u32 %v2359_v52, %v2110_v34  ;;  %v1969_v48 = vor.u32 %v2323_v18, %v1966_v54  ;;  %v2347_v20 = vld [vmem:[#allocation7 + $0x14c] sm:$0xf]  ;;  %v2062_v33 = vld [vmem:[#allocation7 + $0x158] sm:$0xf0] }
  0xb8   :  { %v2065_v34 = vor.u32 %v2347_v20, %v2062_v33  ;;  %v1918_v18 = vld [vmem:[#allocation7 + $0x38] sm:$0xf0]  ;;  %v2307_v21 = vld [vmem:[#allocation7 + $0xc] sm:$0xf] }
  0xb9   :  { %1310 = vmatpush.bf16.msra.mxu3 %v1917_v1  ;;  %1365 = vmatpush.bf16.msra.mxu1 %v2189_v37  ;;  %v2238_v1 = vld [vmem:[#allocation7 + $0x2b8] sm:$0xf0]  ;;  %v2339_v3 = vld [vmem:[#allocation7 + $0x10c] sm:$0xf] }
  0xba   :  { %1338 = vmatpush.bf16.msra.mxu0 %v2045_v39  ;;  %v2241_v37 = vor.u32 %v2391_v31, %v2238_v1  ;;  %v2190_v54 = vld [vmem:[#allocation7 + $0x258] sm:$0xf0] }
  0xbb   :  { %1103 = vmatmul.bf16.gmra.mxu0 %v3016_v19  ;;  %1131 = vmatmul.bf16.gmra.mxu1 %v3018_v62  ;;  %v1902_v45 = vld [vmem:[#allocation7 + $0x18] sm:$0xf0] }
  0xbc   :  { %1159 = vmatmul.bf16.gmra.mxu2 %v3020_v41  ;;  %2293 = vmatmul.msk.bf16.gmra.mxu3 %vm146_vm0, %v3022_v10 }
  0xbd   :  { %1311 = vmatpush.bf16.msra.mxu3 %v1901_v11  ;;  %1366 = vmatpush.bf16.msra.mxu1 %v2173_v56  ;;  %v2097_v56 = vor.u32 %v2355_v55, %v2094_v58  ;;  %v2343_v55 = vld [vmem:[#allocation7 + $0x12c] sm:$0xf]  ;;  %v2046_v58 = vld [vmem:[#allocation7 + $0x138] sm:$0xf0] }
  0xbe   :  { %1339 = vmatpush.bf16.msra.mxu0 %v2029_v17 }
  0xc1   :  { %1367 = vmatpush.bf16.msra.mxu1 %v2157_v12 }
  0xcb   :  { %1228 = vmatmul.bf16.vlgmr.msrb.gmra.mxu0 %v2931_v43  ;;  %1256 = vmatmul.bf16.vlgmr.msrb.gmra.mxu1 %v2933_v4 }
  0xcc   :  { %1200 = vmatmul.bf16.vlgmr.msrb.gmra.mxu3 %v2929_v42  ;;  %2294 = vmatmul.msk.bf16.vlgmr.msrb.gmra.mxu2 %vm146_vm0, %v2935_v6 }
  0xcd   :  { %1416 = vmatpush.bf16.msrb.mxu3 %v2017_v35  ;;  %1507 = vmatpush.bf16.msrb.mxu2 %v2289_v29  ;;  %v2315_v29 = vld [vmem:[#allocation7 + $0x4c] sm:$0xf] }
  0xce   :  { %1444 = vmatpush.bf16.msrb.mxu0 %v2145_v51  ;;  %1472 = vmatpush.bf16.msrb.mxu1 %v2273_v7  ;;  %v1934_v51 = vld [vmem:[#allocation7 + $0x58] sm:$0xf0] }
  0xcf   :  { %v1937_v60 = vor.u32 %v2315_v29, %v1934_v51 }
  0xd1   :  { %1417 = vmatpush.bf16.msrb.mxu3 %v2001_v63  ;;  %v2383_v63 = vld [vmem:[#allocation7 + $0x26c] sm:$0xf] }
  0xd2   :  { %1445 = vmatpush.bf16.msrb.mxu0 %v2129_v49  ;;  %1473 = vmatpush.bf16.msrb.mxu1 %v2257_v24  ;;  %v2209_v8 = vor.u32 %v2383_v63, %v2206_v59 }
  0xd5   :  { %1418 = vmatpush.bf16.msrb.mxu3 %v1985_v50  ;;  %v2311_v50 = vld [vmem:[#allocation7 + $0x2c] sm:$0xf] }
  0xd6   :  { %1446 = vmatpush.bf16.msrb.mxu0 %v2113_v47  ;;  %1474 = vmatpush.bf16.msrb.mxu1 %v2241_v37  ;;  %v2379_v47 = vld [vmem:[#allocation7 + $0x24c] sm:$0xf] }
  0xd9   :  { %1419 = vmatpush.bf16.msrb.mxu3 %v1969_v48  ;;  %v2193_v48 = vor.u32 %v2379_v47, %v2190_v54 }
  0xda   :  { %1447 = vmatpush.bf16.msrb.mxu0 %v2097_v56  ;;  %1475 = vmatpush.bf16.msrb.mxu1 %v2225_v57  ;;  %v2371_v57 = vld [vmem:[#allocation7 + $0x20c] sm:$0xf] }
  0xdb   :  { %1233 = vmatmul.bf16.gmra.mxu0 %v2956_v22  ;;  %1261 = vmatmul.bf16.gmra.mxu1 %v2958_v14 }
  0xdc   :  { %1205 = vmatmul.bf16.gmra.mxu3 %v2954_v13  ;;  %2295 = vmatmul.msk.bf16.gmra.mxu2 %vm146_vm0, %v2960_v28 }
  0xdd   :  { %1420 = vmatpush.bf16.msrb.mxu3 %v1953_v46  ;;  %v2030_v46 = vld [vmem:[#allocation7 + $0x118] sm:$0xf0] }
  0xde   :  { %1448 = vmatpush.bf16.msrb.mxu0 %v2081_v53  ;;  %1476 = vmatpush.bf16.msrb.mxu1 %v2209_v8 }
  0xe1   :  { %1421 = vmatpush.bf16.msrb.mxu3 %v1937_v60 }
  0xe2   :  { %1449 = vmatpush.bf16.msrb.mxu0 %v2065_v34  ;;  %1477 = vmatpush.bf16.msrb.mxu1 %v2193_v48 }
  0xeb   :  { %1238 = vmatmul.bf16.gmra.mxu0 %v2993_v40  ;;  %1266 = vmatmul.bf16.gmra.mxu1 %v2995_v38 }
  0xec   :  { %1210 = vmatmul.bf16.gmra.mxu3 %v2991_v44  ;;  %2296 = vmatmul.msk.bf16.gmra.mxu2 %vm146_vm0, %v2997_v32 }
  0xfb   :  { %1243 = vmatmul.bf16.gmra.mxu0 %v3018_v62  ;;  %1271 = vmatmul.bf16.gmra.mxu1 %v3020_v41 }
  0xfc   :  { %1215 = vmatmul.bf16.gmra.mxu3 %v3016_v19  ;;  %2297 = vmatmul.msk.bf16.gmra.mxu2 %vm146_vm0, %v3022_v10 }
 0x108   :  { %v1089_v61 = vpop.f32.mrf.mxu0  ;;  %v1117_v25 = vpop.f32.mrf.mxu1 }
 0x109   :  { %v1118_v39 = vadd.f32 %v1117_v25, %v1089_v61  ;;  %v1921_v25 = vor.u32 %v2311_v50, %v1918_v18 }
 0x10b   :  { %1340 = vmatmul.bf16.vlgmr.msra.gmra.mxu0 %v2931_v43  ;;  %1368 = vmatmul.bf16.vlgmr.msra.gmra.mxu1 %v2933_v4 }
 0x10c   :  { %1312 = vmatmul.bf16.vlgmr.msra.gmra.mxu3 %v2929_v42  ;;  %2298 = vmatmul.msk.bf16.vlgmr.msra.gmra.mxu2 %vm146_vm0, %v2935_v6 }
 0x10d   :  { %1422 = vmatpush.bf16.msrb.mxu3 %v1921_v25 }
 0x10f   :  { %v1145_v11 = vpop.f32.mrf.mxu2  ;;  %v1173_v23 = vpop.f32.mrf.mxu3 }
 0x110   :  { %v1146_v17 = vadd.f32 %v1145_v11, %v1118_v39  ;;  %v1091_v5 = vpop.f32.mrf.mxu0  ;;  %v1119_v12 = vpop.f32.mrf.mxu1  ;;  %v2049_v11 = vor.u32 %v2343_v55, %v2046_v58 }
 0x111   :  { %v1120_v35 = vadd.f32 %v1119_v12, %v1091_v5  ;;  %v1905_v12 = vor.u32 %v2307_v21, %v1902_v45 }
 0x112   :  { %v3054_v15 = vadd.f32 %v1173_v23, %v1146_v17  ;;  %v2174_v23 = vld [vmem:[#allocation7 + $0x238] sm:$0xf0]  ;;  %1450 = vmatpush.bf16.msrb.mxu0 %v2049_v11 }
 0x113   :  { %v2177_v56 = vor.u32 %v2375_v9, %v2174_v23  ;;  %1423 = vmatpush.bf16.msrb.mxu3 %v1905_v12 }
 0x115   :  { %1478 = vmatpush.bf16.msrb.mxu1 %v2177_v56 }
 0x117   :  { %v1147_v36 = vpop.f32.mrf.mxu2  ;;  %v1175_v30 = vpop.f32.mrf.mxu3 }
 0x118   :  { %v1148_v2 = vadd.f32 %v1147_v36, %v1120_v35  ;;  %v1094_v7 = vpop.f32.mrf.mxu0  ;;  %v1122_v0 = vpop.f32.mrf.mxu1  ;;  %v2158_v35 = vld [vmem:[#allocation7 + $0x218] sm:$0xf0]  ;;  %v2033_v36 = vor.u32 %v2339_v3, %v2030_v46 }
 0x119   :  { %v1123_v49 = vadd.f32 %v1122_v0, %v1094_v7 }
 0x11a   :  { %v3056_v16 = vadd.f32 %v1175_v30, %v1148_v2  ;;  %v2161_v30 = vor.u32 %v2371_v57, %v2158_v35  ;;  %1451 = vmatpush.bf16.msrb.mxu0 %v2033_v36 }
 0x11b   :  { %1345 = vmatmul.bf16.gmra.mxu0 %v2956_v22  ;;  %1373 = vmatmul.bf16.gmra.mxu1 %v2958_v14 }
 0x11c   :  { %1317 = vmatmul.bf16.gmra.mxu3 %v2954_v13  ;;  %2299 = vmatmul.msk.bf16.gmra.mxu2 %vm146_vm0, %v2960_v28 }
 0x11d   :  { %1479 = vmatpush.bf16.msrb.mxu1 %v2161_v30 }
 0x11f   :  { %v1150_v24 = vpop.f32.mrf.mxu2  ;;  %v1178_v52 = vpop.f32.mrf.mxu3 }
 0x120   :  { %v1151_v31 = vadd.f32 %v1150_v24, %v1123_v49  ;;  %v1096_v1 = vpop.f32.mrf.mxu0  ;;  %v1124_v61 = vpop.f32.mrf.mxu1 }
 0x121   :  { %v1125_v37 = vadd.f32 %v1124_v61, %v1096_v1 }
 0x122   :  { %v3063_v39 = vadd.f32 %v1178_v52, %v1151_v31 }
 0x127   :  { %v1152_v17 = vpop.f32.mrf.mxu2  ;;  %v1180_v5 = vpop.f32.mrf.mxu3 }
 0x128   :  { %v1153_v26 = vadd.f32 %v1152_v17, %v1125_v37  ;;  %v1099_v27 = vpop.f32.mrf.mxu0  ;;  %v1127_v29 = vpop.f32.mrf.mxu1 }
 0x129   :  { %v1128_v53 = vadd.f32 %v1127_v29, %v1099_v27 }
 0x12a   :  { %v3065_v51 = vadd.f32 %v1180_v5, %v1153_v26 }
 0x12b   :  { %1350 = vmatmul.bf16.gmra.mxu0 %v2993_v40  ;;  %1378 = vmatmul.bf16.gmra.mxu1 %v2995_v38 }
 0x12c   :  { %1322 = vmatmul.bf16.gmra.mxu3 %v2991_v44  ;;  %2300 = vmatmul.msk.bf16.gmra.mxu2 %vm146_vm0, %v2997_v32 }
 0x12f   :  { %v1155_v63 = vpop.f32.mrf.mxu2  ;;  %v1183_v59 = vpop.f32.mrf.mxu3 }
 0x130   :  { %v1156_v2 = vadd.f32 %v1155_v63, %v1128_v53  ;;  %v1101_v7 = vpop.f32.mrf.mxu0  ;;  %v1129_v0 = vpop.f32.mrf.mxu1 }
 0x131   :  { %v1130_v60 = vadd.f32 %v1129_v0, %v1101_v7 }
 0x132   :  { %v3072_v8 = vadd.f32 %v1183_v59, %v1156_v2 }
 0x137   :  { %v1157_v49 = vpop.f32.mrf.mxu2  ;;  %v1185_v20 = vpop.f32.mrf.mxu3 }
 0x138   :  { %v1158_v33 = vadd.f32 %v1157_v49, %v1130_v60  ;;  %v1104_v50 = vpop.f32.mrf.mxu0  ;;  %v1132_v24 = vpop.f32.mrf.mxu1 }
 0x139   :  { %v1133_v52 = vadd.f32 %v1132_v24, %v1104_v50 }
 0x13a   :  { %v3074_v34 = vadd.f32 %v1185_v20, %v1158_v33 }
 0x13b   :  { %1355 = vmatmul.bf16.gmra.mxu0 %v3018_v62  ;;  %1383 = vmatmul.bf16.gmra.mxu1 %v3020_v41 }
 0x13c   :  { %1327 = vmatmul.bf16.gmra.mxu3 %v3016_v19  ;;  %2301 = vmatmul.msk.bf16.gmra.mxu2 %vm146_vm0, %v3022_v10 }
 0x13f   :  { %v1160_v18 = vpop.f32.mrf.mxu2  ;;  %v1188_v47 = vpop.f32.mrf.mxu3 }
 0x140   :  { %v1161_v54 = vadd.f32 %v1160_v18, %v1133_v52  ;;  %v1106_v31 = vpop.f32.mrf.mxu0  ;;  %v1134_v1 = vpop.f32.mrf.mxu1 }
 0x142   :  { %v3081_v61 = vadd.f32 %v1188_v47, %v1161_v54 }
 0x144   :  { %3452 = vst [vmem:[#allocation18_spill] sm:$0xff] %v3081_v61 }
 0x147   :  { %v1162_v25 = vpop.f32.mrf.mxu2  ;;  %v1190_v48 = vpop.f32.mrf.mxu3 }
 0x148   :  { %v1229_v37 = vpop.f32.mrf.mxu0  ;;  %v1257_v55 = vpop.f32.mrf.mxu1 }
 0x14b   :  { %1452 = vmatmul.bf16.vlgmr.msrb.gmra.mxu0 %v2931_v43  ;;  %1480 = vmatmul.bf16.vlgmr.msrb.gmra.mxu1 %v2933_v4 }
 0x14c   :  { %1424 = vmatmul.bf16.vlgmr.msrb.gmra.mxu3 %v2929_v42  ;;  %2302 = vmatmul.msk.bf16.vlgmr.msrb.gmra.mxu2 %vm146_vm0, %v2935_v6 }
 0x14f   :  { %v1201_v58 = vpop.f32.mrf.mxu3  ;;  %v1285_v9 = vpop.f32.mrf.mxu2 }
 0x150   :  { %v1230_v11 = vadd.f32 %v1229_v37, %v1201_v58  ;;  %v1231_v23 = vpop.f32.mrf.mxu0  ;;  %v1259_v56 = vpop.f32.mrf.mxu1 }
 0x152   :  { %v1258_v21 = vadd.f32 %v1257_v55, %v1230_v11 }
 0x154   :  { %v3088_v45 = vadd.f32 %v1285_v9, %v1258_v21 }
 0x157   :  { %v1203_v3 = vpop.f32.mrf.mxu3  ;;  %v1287_v17 = vpop.f32.mrf.mxu2 }
 0x158   :  { %v1232_v5 = vadd.f32 %v1231_v23, %v1203_v3  ;;  %v1234_v12 = vpop.f32.mrf.mxu0  ;;  %v1262_v43 = vpop.f32.mrf.mxu1 }
 0x15a   :  { %v1260_v46 = vadd.f32 %v1259_v56, %v1232_v5 }
 0x15b   :  { %1457 = vmatmul.bf16.gmra.mxu0 %v2956_v22  ;;  %1485 = vmatmul.bf16.gmra.mxu1 %v2958_v14 }
 0x15c   :  { %v3092_v42 = vadd.f32 %v1287_v17, %v1260_v46  ;;  %1429 = vmatmul.bf16.gmra.mxu3 %v2954_v13  ;;  %2303 = vmatmul.msk.bf16.gmra.mxu2 %vm146_vm0, %v2960_v28 }
 0x15f   :  { %v1206_v4 = vpop.f32.mrf.mxu3  ;;  %v1290_v6 = vpop.f32.mrf.mxu2 }
 0x160   :  { %v1235_v57 = vadd.f32 %v1234_v12, %v1206_v4  ;;  %v1236_v35 = vpop.f32.mrf.mxu0  ;;  %v1264_v26 = vpop.f32.mrf.mxu1 }
 0x162   :  { %v1263_v27 = vadd.f32 %v1262_v43, %v1235_v57 }
 0x164   :  { %v3097_v29 = vadd.f32 %v1290_v6, %v1263_v27 }
 0x167   :  { %v1208_v36 = vpop.f32.mrf.mxu3  ;;  %v1292_v30 = vpop.f32.mrf.mxu2 }
 0x168   :  { %v1237_v22 = vadd.f32 %v1236_v35, %v1208_v36  ;;  %v1239_v53 = vpop.f32.mrf.mxu0  ;;  %v1267_v14 = vpop.f32.mrf.mxu1 }
 0x16a   :  { %v1265_v63 = vadd.f32 %v1264_v26, %v1237_v22 }
 0x16b   :  { %1462 = vmatmul.bf16.gmra.mxu0 %v2993_v40  ;;  %1490 = vmatmul.bf16.gmra.mxu1 %v2995_v38 }
 0x16c   :  { %v3101_v13 = vadd.f32 %v1292_v30, %v1265_v63  ;;  %1434 = vmatmul.bf16.gmra.mxu3 %v2991_v44  ;;  %2304 = vmatmul.msk.bf16.gmra.mxu2 %vm146_vm0, %v2997_v32 }
 0x16f   :  { %v1211_v28 = vpop.f32.mrf.mxu3  ;;  %v1295_v59 = vpop.f32.mrf.mxu2 }
 0x170   :  { %v1240_v2 = vadd.f32 %v1239_v53, %v1211_v28  ;;  %v1241_v7 = vpop.f32.mrf.mxu0  ;;  %v1269_v0 = vpop.f32.mrf.mxu1 }
 0x172   :  { %v1268_v60 = vadd.f32 %v1267_v14, %v1240_v2 }
 0x174   :  { %v3106_v49 = vadd.f32 %v1295_v59, %v1268_v60 }
 0x177   :  { %v1213_v20 = vpop.f32.mrf.mxu3  ;;  %v1297_v33 = vpop.f32.mrf.mxu2 }
 0x178   :  { %v1242_v40 = vadd.f32 %v1241_v7, %v1213_v20  ;;  %v1244_v50 = vpop.f32.mrf.mxu0  ;;  %v1272_v38 = vpop.f32.mrf.mxu1 }
 0x17a   :  { %v1270_v24 = vadd.f32 %v1269_v0, %v1242_v40 }
 0x17b   :  { %1467 = vmatmul.bf16.gmra.mxu0 %v3018_v62  ;;  %1495 = vmatmul.bf16.gmra.mxu1 %v3020_v41 }
 0x17c   :  { %v3110_v44 = vadd.f32 %v1297_v33, %v1270_v24  ;;  %1439 = vmatmul.bf16.gmra.mxu3 %v3016_v19  ;;  %2305 = vmatmul.msk.bf16.gmra.mxu2 %vm146_vm0, %v3022_v10 }
 0x17f   :  { %v1216_v32 = vpop.f32.mrf.mxu3  ;;  %v1300_v52 = vpop.f32.mrf.mxu2 }
 0x180   :  { %v1245_v18 = vadd.f32 %v1244_v50, %v1216_v32  ;;  %v1246_v47 = vpop.f32.mrf.mxu0  ;;  %v1274_v54 = vpop.f32.mrf.mxu1 }
 0x182   :  { %v1273_v31 = vadd.f32 %v1272_v38, %v1245_v18 }
 0x184   :  { %v3115_v1 = vadd.f32 %v1300_v52, %v1273_v31 }
 0x186   :  { %3453 = vst [vmem:[#allocation15_spill] sm:$0xff] %v3115_v1 }
 0x187   :  { %v1218_v25 = vpop.f32.mrf.mxu3  ;;  %v1302_v48 = vpop.f32.mrf.mxu2 }
 0x188   :  { %v1341_v62 = vpop.f32.mrf.mxu0  ;;  %v1369_v37 = vpop.f32.mrf.mxu1 }
 0x18f   :  { %v1313_v41 = vpop.f32.mrf.mxu3  ;;  %v1397_v55 = vpop.f32.mrf.mxu2 }
 0x190   :  { %v1342_v58 = vadd.f32 %v1341_v62, %v1313_v41  ;;  %v1343_v9 = vpop.f32.mrf.mxu0  ;;  %v1371_v19 = vpop.f32.mrf.mxu1 }
 0x192   :  { %v1370_v11 = vadd.f32 %v1369_v37, %v1342_v58 }
 0x194   :  { %v3117_v23 = vadd.f32 %v1397_v55, %v1370_v11 }
 0x197   :  { %v1315_v10 = vpop.f32.mrf.mxu3  ;;  %v1399_v56 = vpop.f32.mrf.mxu2 }
 0x198   :  { %v1344_v21 = vadd.f32 %v1343_v9, %v1315_v10  ;;  %v1346_v3 = vpop.f32.mrf.mxu0  ;;  %v1374_v17 = vpop.f32.mrf.mxu1  ;;  %v1594_v9 = vmul.f32 %v3056_v16, %v3056_v16  ;;  %v1528_v10 = vadd.f32 %v3056_v16, %v3054_v15 }
 0x19a   :  { %v1372_v5 = vadd.f32 %v1371_v19, %v1344_v21 }
 0x19c   :  { %v3119_v12 = vadd.f32 %v1399_v56, %v1372_v5  ;;  %v1529_v5 = vadd.f32 %v1528_v10, %v3063_v39 }
 0x19f   :  { %v1318_v43 = vpop.f32.mrf.mxu3  ;;  %v1402_v46 = vpop.f32.mrf.mxu2 }
 0x1a0   :  { %v1347_v4 = vadd.f32 %v1346_v3, %v1318_v43  ;;  %v1348_v6 = vpop.f32.mrf.mxu0  ;;  %v1376_v57 = vpop.f32.mrf.mxu1  ;;  %v1590_v3 = vmul.f32 %v3054_v15, %v3054_v15 }
 0x1a2   :  { %v1375_v35 = vadd.f32 %v1374_v17, %v1347_v4  ;;  %v1598_v17 = vmul.f32 %v3063_v39, %v3063_v39  ;;  %v1618_v43 = vadd.f32 %v1594_v9, %v1590_v3  ;;  %v1530_v4 = vadd.f32 %v1529_v5, %v3065_v51 }
 0x1a3   :  { %v1546_v5 = vsel %vm111_vm1, %v3115_v1, 0.0 }
 0x1a4   :  { %v3121_v26 = vadd.f32 %v1402_v46, %v1375_v35  ;;  %v1602_v46 = vmul.f32 %v3065_v51, %v3065_v51  ;;  %v1619_v35 = vadd.f32 %v1618_v43, %v1598_v17  ;;  %v1615_v43 = vmul.f32 %v3115_v1, %v3115_v1 }
 0x1a7   :  { %v1320_v27 = vpop.f32.mrf.mxu3  ;;  %v1404_v36 = vpop.f32.mrf.mxu2 }
 0x1a8   :  { %v1349_v30 = vadd.f32 %v1348_v6, %v1320_v27  ;;  %v1351_v22 = vpop.f32.mrf.mxu0  ;;  %v1379_v53 = vpop.f32.mrf.mxu1  ;;  %v1541_v6 = vadd.f32 %v3092_v42, %v3088_v45  ;;  %v1531_v27 = vadd.f32 %v1530_v4, %v3072_v8 }
 0x1aa   :  { %v1377_v14 = vadd.f32 %v1376_v57, %v1349_v30  ;;  %v1595_v57 = vmul.f32 %v3092_v42, %v3092_v42  ;;  %v1542_v30 = vadd.f32 %v1541_v6, %v3097_v29 }
 0x1ac   :  { %v3123_v63 = vadd.f32 %v1404_v36, %v1377_v14  ;;  %v1591_v36 = vmul.f32 %v3088_v45, %v3088_v45  ;;  %v1606_v14 = vmul.f32 %v3072_v8, %v3072_v8 }
 0x1ae   :  { %v1604_v10 = vmul.f32 %v3123_v63, %v3123_v63 }
 0x1af   :  { %v1323_v28 = vpop.f32.mrf.mxu3  ;;  %v1407_v59 = vpop.f32.mrf.mxu2 }
 0x1b0   :  { %v1352_v2 = vadd.f32 %v1351_v22, %v1323_v28  ;;  %v1353_v7 = vpop.f32.mrf.mxu0  ;;  %v1381_v0 = vpop.f32.mrf.mxu1  ;;  %v1599_v22 = vmul.f32 %v3097_v29, %v3097_v29  ;;  %v1554_v28 = vadd.f32 %v3119_v12, %v3117_v23 }
 0x1b2   :  { %v1380_v60 = vadd.f32 %v1379_v53, %v1352_v2  ;;  %v1620_v53 = vadd.f32 %v1619_v35, %v1602_v46  ;;  %v1611_v46 = vmul.f32 %v3110_v44, %v3110_v44 }
 0x1b4   :  { %v3125_v20 = vadd.f32 %v1407_v59, %v1380_v60  ;;  %v1596_v59 = vmul.f32 %v3119_v12, %v3119_v12  ;;  %v1631_v60 = vadd.f32 %v1595_v57, %v1591_v36 }
 0x1b6   :  { %v1608_v57 = vmul.f32 %v3125_v20, %v3125_v20 }
 0x1b7   :  { %v1325_v33 = vpop.f32.mrf.mxu3  ;;  %v1409_v40 = vpop.f32.mrf.mxu2 }
 0x1b8   :  { %v1354_v50 = vadd.f32 %v1353_v7, %v1325_v33  ;;  %v1356_v38 = vpop.f32.mrf.mxu0  ;;  %v1384_v24 = vpop.f32.mrf.mxu1  ;;  %v1543_v33 = vadd.f32 %v1542_v30, %v3101_v13 }
 0x1ba   :  { %v1382_v32 = vadd.f32 %v1381_v0, %v1354_v50  ;;  %v1532_v0 = vadd.f32 %v1531_v27, %v3074_v34 }
 0x1bc   :  { %v3127_v52 = vadd.f32 %v1409_v40, %v1382_v32  ;;  %v1603_v40 = vmul.f32 %v3101_v13, %v3101_v13  ;;  %v1592_v32 = vmul.f32 %v3117_v23, %v3117_v23 }
 0x1bf   :  { %v1328_v18 = vpop.f32.mrf.mxu3  ;;  %v1412_v47 = vpop.f32.mrf.mxu2 }
 0x1c0   :  { %v1357_v54 = vadd.f32 %v1356_v38, %v1328_v18  ;;  %v1358_v31 = vpop.f32.mrf.mxu0  ;;  %v1386_v25 = vpop.f32.mrf.mxu1  ;;  %v1555_v18 = vadd.f32 %v1554_v28, %v3121_v26 }
 0x1c1   :  { %v1632_v31 = vadd.f32 %v1631_v60, %v1599_v22  ;;  %v1544_v25 = vadd.f32 %v1543_v33, %v3106_v49  ;;  %v1612_v60 = vmul.f32 %v3127_v52, %v3127_v52 }
 0x1c2   :  { %v1385_v48 = vadd.f32 %v1384_v24, %v1357_v54  ;;  %v1610_v24 = vmul.f32 %v3074_v34, %v3074_v34  ;;  %v1533_v54 = vsel %vm111_vm1, %v3081_v61, 0.0  ;;  %v1556_v9 = vadd.f32 %v1555_v18, %v3123_v63 }
 0x1c3   :  { %v1633_v3 = vadd.f32 %v1632_v31, %v1603_v40  ;;  %v1545_v17 = vadd.f32 %v1544_v25, %v3110_v44  ;;  %v1534_v35 = vadd.f32 %v1533_v54, %v1532_v0  ;;  %v1636_v18 = vsel %vm111_vm1, %v1615_v43, 0.0 }
 0x1c4   :  { %v3129_v62 = vadd.f32 %v1412_v47, %v1385_v48  ;;  %v1600_v47 = vmul.f32 %v3121_v26, %v3121_v26  ;;  %v1607_v48 = vmul.f32 %v3106_v49, %v3106_v49  ;;  %v1557_v6 = vadd.f32 %v1556_v9, %v3125_v20 }
 0x1c5   :  { %v1547_v22 = vadd.f32 %v1546_v5, %v1545_v17 }
 0x1c6   :  { %3454 = vst [vmem:[#allocation19_spill] sm:$0xff] %v3129_v62  ;;  %v1634_v27 = vadd.f32 %v1633_v3, %v1607_v48  ;;  %v1559_v36 = vsel %vm111_vm1, %v3129_v62, 0.0  ;;  %v1616_v30 = vmul.f32 %v3129_v62, %v3129_v62 }
 0x1c7   :  { %v1330_v37 = vpop.f32.mrf.mxu3  ;;  %v1414_v41 = vpop.f32.mrf.mxu2  ;;  %v1548_v3 = vrot.slane %v1547_v22, 4 }
 0x1c8   :  { %v3131_v55 = vpop.f32.mrf.mxu0  ;;  %v3133_v58 = vpop.f32.mrf.mxu1  ;;  %v1614_v37 = vmul.f32 %v3081_v61, %v3081_v61  ;;  %v1644_v41 = vadd.f32 %v1596_v59, %v1592_v32  ;;  %v1558_v59 = vadd.f32 %v1557_v6, %v3127_v52  ;;  %v1621_v32 = vadd.f32 %v1620_v53, %v1606_v14 }
 0x1c9   :  { %v1635_v54 = vadd.f32 %v1634_v27, %v1611_v46  ;;  %v1649_v9 = vsel %vm111_vm1, %v1616_v30, 0.0  ;;  %v1549_v14 = vadd.f32 %v1548_v3, %v1547_v22 }
 0x1ca   :  { %v1645_v4 = vadd.f32 %v1644_v41, %v1600_v47  ;;  %v1560_v25 = vadd.f32 %v1559_v36, %v1558_v59  ;;  %v1622_v48 = vadd.f32 %v1621_v32, %v1610_v24  ;;  %v1623_v41 = vsel %vm111_vm1, %v1614_v37, 0.0 }
 0x1cb   :  { %v1637_v17 = vadd.f32 %v1636_v18, %v1635_v54 }
 0x1cc   :  { %v1646_v28 = vadd.f32 %v1645_v4, %v1604_v10  ;;  %v1535_v10 = vrot.slane %v1534_v35, 4  ;;  %v1624_v4 = vadd.f32 %v1623_v41, %v1622_v48  ;;  %v1561_v6 = vrot.slane %v1560_v25, 4 }
 0x1cd   :  { %v1638_v43 = vrot.slane %v1637_v17, 4 }
 0x1ce   :  { %v1647_v31 = vadd.f32 %v1646_v28, %v1608_v57  ;;  %v1536_v53 = vadd.f32 %v1535_v10, %v1534_v35  ;;  %v1625_v27 = vrot.slane %v1624_v4, 4  ;;  %v1562_v24 = vadd.f32 %v1561_v6, %v1560_v25 }
 0x1cf   :  { %v3137_v19 = vpop.f32.mrf.mxu3  ;;  %v3139_v11 = vpop.f32.mrf.mxu2  ;;  %v1550_v28 = vrot.slane %v1549_v14, 2  ;;  %v1639_v30 = vadd.f32 %v1638_v43, %v1637_v17 }
 0x1d0   :  { %v3143_v56 = vpop.f32.mrf.mxu0  ;;  %v3145_v21 = vpop.f32.mrf.mxu1  ;;  %v1648_v5 = vadd.f32 %v1647_v31, %v1612_v60  ;;  %v1537_v37 = vrot.slane %v1536_v53, 2  ;;  %v1626_v60 = vadd.f32 %v1625_v27, %v1624_v4  ;;  %v1563_v32 = vrot.slane %v1562_v24, 2 }
 0x1d1   :  { %v1454_v35 = vadd.f32 %v3131_v55, %v3137_v19  ;;  %v1551_v31 = vadd.f32 %v1550_v28, %v1549_v14  ;;  %v1640_v48 = vrot.slane %v1639_v30, 2 }
 0x1d2   :  { %v1650_v62 = vadd.f32 %v1649_v9, %v1648_v5  ;;  %v1538_v54 = vadd.f32 %v1537_v37, %v1536_v53  ;;  %v1627_v5 = vrot.slane %v1626_v60, 2 }
 0x1d4   :  { %v1651_v36 = vrot.slane %v1650_v62, 4  ;;  %v1539_v19 = vrot.slane %v1538_v54, 1  ;;  %v1628_v14 = vadd.f32 %v1627_v5, %v1626_v60 }
 0x1d6   :  { %v1652_v18 = vadd.f32 %v1651_v36, %v1650_v62  ;;  %v1482_v62 = vadd.f32 %v3133_v58, %v1454_v35  ;;  %v1540_v58 = vadd.f32 %v1539_v19, %v1538_v54 }
 0x1d7   :  { %v3171_v2 = vpop.f32.mrf.mxu3  ;;  %v3173_v7 = vpop.f32.mrf.mxu2 }
 0x1d8   :  { %v3179_v50 = vpop.f32.mrf.mxu0  ;;  %v3181_v38 = vpop.f32.mrf.mxu1  ;;  %v1456_v59 = vadd.f32 %v3143_v56, %v3171_v2  ;;  %v1564_v56 = vadd.f32 %v1563_v32, %v1562_v24  ;;  %v1653_v2 = vrot.slane %v1652_v18, 2 }
 0x1da   :  { %v1484_v9 = vadd.f32 %v3145_v21, %v1456_v59  ;;  %v1565_v21 = vrot.slane %v1564_v56, 1  ;;  %v1629_v59 = vrot.slane %v1628_v14, 1 }
 0x1dc   :  { %v3229_v6 = vadd.f32 %v3173_v7, %v1484_v9  ;;  %v1566_v60 = vadd.f32 %v1565_v21, %v1564_v56 }
 0x1de   :  { %v1597_v37 = vmul.f32 %v3229_v6, %v3229_v6 }
 0x1df   :  { %v1430_v33 = vpop.f32.mrf.mxu3  ;;  %v1514_v40 = vpop.f32.mrf.mxu2 }
 0x1e0   :  { %v1460_v0 = vpop.f32.mrf.mxu0  ;;  %v1488_v47 = vpop.f32.mrf.mxu1  ;;  %v1459_v22 = vadd.f32 %v3179_v50, %v1430_v33  ;;  %v1552_v50 = vrot.slane %v1551_v31, 1  ;;  %v1641_v33 = vadd.f32 %v1640_v48, %v1639_v30  ;;  %v1658_v48 = vsel %vm146_vm0, %v1597_v37, 0.0 }
 0x1e2   :  { %v1487_v4 = vadd.f32 %v3181_v38, %v1459_v22  ;;  %v1553_v24 = vadd.f32 %v1552_v50, %v1551_v31  ;;  %v1642_v38 = vrot.slane %v1641_v33, 1 }
 0x1e4   :  { %v3234_v43 = vadd.f32 %v1514_v40, %v1487_v4  ;;  %v3250_v22 = vmul.f32 0.020408163, %v1553_v24  ;;  %v1643_v54 = vadd.f32 %v1642_v38, %v1641_v33 }
 0x1e6   :  { %v1601_v32 = vmul.f32 %v3234_v43, %v3234_v43  ;;  %v1681_v19 = vmul.f32 %v3250_v22, %v3250_v22 }
 0x1e7   :  { %v1432_v1 = vpop.f32.mrf.mxu3  ;;  %v1516_v61 = vpop.f32.mrf.mxu2 }
 0x1e8   :  { %v1463_v46 = vpop.f32.mrf.mxu0  ;;  %v1491_v57 = vpop.f32.mrf.mxu1  ;;  %v1461_v10 = vadd.f32 %v1460_v0, %v1432_v1  ;;  %v1654_v1 = vadd.f32 %v1653_v2, %v1652_v18  ;;  %v3232_v0 = vadd.f32 %v3139_v11, %v1482_v62  ;;  %v1660_v2 = vsel %vm146_vm0, %v1601_v32, 0.0 }
 0x1ea   :  { %v1489_v53 = vadd.f32 %v1488_v47, %v1461_v10  ;;  %v1655_v11 = vrot.slane %v1654_v1, 1  ;;  %v1593_v40 = vmul.f32 %v3232_v0, %v3232_v0  ;;  %v1567_v31 = vsel %vm146_vm0, %v3232_v0, 0.0 }
 0x1ec   :  { %v3238_v7 = vadd.f32 %v1516_v61, %v1489_v53  ;;  %v3248_v61 = vmul.f32 0.020408163, %v1540_v58  ;;  %v1657_v56 = vsel %vm146_vm0, %v1593_v40, 0.0 }
 0x1ed   :  { %v1659_v50 = vadd.f32 %v1658_v48, %v1657_v56 }
 0x1ee   :  { %v1605_v9 = vmul.f32 %v3238_v7, %v3238_v7  ;;  %v1572_v62 = vsel %vm146_vm0, %v3238_v7, 0.0 }
 0x1ef   :  { %v1435_v41 = vpop.f32.mrf.mxu3  ;;  %v1519_v25 = vpop.f32.mrf.mxu2  ;;  %v1661_v37 = vadd.f32 %v1660_v2, %v1659_v50 }
 0x1f0   :  { %v1465_v3 = vpop.f32.mrf.mxu0  ;;  %v1493_v17 = vpop.f32.mrf.mxu1  ;;  %v1464_v55 = vadd.f32 %v1463_v46, %v1435_v41  ;;  %v1570_v41 = vsel %vm146_vm0, %v3234_v43, 0.0  ;;  %v1662_v21 = vsel %vm146_vm0, %v1605_v9, 0.0 }
 0x1f2   :  { %v1492_v27 = vadd.f32 %v1491_v57, %v1464_v55  ;;  %v1568_v57 = vsel %vm146_vm0, %v3229_v6, 0.0  ;;  %v1677_v55 = vmul.f32 0.020408163, %v1643_v54 }
 0x1f3   :  { %v1569_v5 = vadd.f32 %v1568_v57, %v1567_v31  ;;  %v1663_v57 = vadd.f32 %v1662_v21, %v1661_v37 }
 0x1f4   :  { %v3246_v18 = vadd.f32 %v1519_v25, %v1492_v27  ;;  %v1630_v25 = vadd.f32 %v1629_v59, %v1628_v14  ;;  %v1685_v40 = vsub.f32 %v1677_v55, %v1681_v19 }
 0x1f5   :  { %v1571_v33 = vadd.f32 %v1570_v41, %v1569_v5 }
 0x1f6   :  { %v1609_v4 = vmul.f32 %v3246_v18, %v3246_v18  ;;  %v1689_v5 = vmax.f32 %v1685_v40, 0.0 }
 0x1f7   :  { %v1437_v46 = vpop.f32.mrf.mxu3  ;;  %v1521_v36 = vpop.f32.mrf.mxu2 }
 0x1f8   :  { %v1466_v47 = vadd.f32 %v1465_v3, %v1437_v46  ;;  %v1468_v28 = vpop.f32.mrf.mxu0  ;;  %v1496_v30 = vpop.f32.mrf.mxu1  ;;  %v3261_v3 = vmul.f32 0.020408163, %v1566_v60  ;;  %v1664_v59 = vsel %vm146_vm0, %v1609_v4, 0.0 }
 0x1f9   :  { %v1665_v41 = vadd.f32 %v1664_v59, %v1663_v57 }
 0x1fa   :  { %v1494_v35 = vadd.f32 %v1493_v17, %v1466_v47  ;;  %v1656_v17 = vadd.f32 %v1655_v11, %v1654_v1  ;;  %v1574_v1 = vsel %vm146_vm0, %v3246_v18, 0.0  ;;  %v1573_v47 = vadd.f32 %v1572_v62, %v1571_v33 }
 0x1fc   :  { %v3259_v10 = vadd.f32 %v1521_v36, %v1494_v35  ;;  %v1678_v46 = vmul.f32 0.020408163, %v1656_v17  ;;  %v1682_v36 = vmul.f32 %v3261_v3, %v3261_v3  ;;  %v1575_v32 = vadd.f32 %v1574_v1, %v1573_v47 }
 0x1fd   :  { %v1676_v35 = vmul.f32 0.020408163, %v1630_v25 }
 0x1fe   :  { %v1613_v27 = vmul.f32 %v3259_v10, %v3259_v10  ;;  %v1576_v60 = vsel %vm146_vm0, %v3259_v10, 0.0  ;;  %v1686_v48 = vsub.f32 %v1678_v46, %v1682_v36 }
 0x1ff   :  { %v1440_v53 = vpop.f32.mrf.mxu3  ;;  %v1524_v14 = vpop.f32.mrf.mxu2  ;;  %v1577_v9 = vadd.f32 %v1576_v60, %v1575_v32 }
 0x200   :  { %v1469_v58 = vadd.f32 %v1468_v28, %v1440_v53  ;;  %v1470_v24 = vpop.f32.mrf.mxu0  ;;  %v1498_v38 = vpop.f32.mrf.mxu1  ;;  %v1680_v28 = vmul.f32 %v3248_v61, %v3248_v61  ;;  %v1666_v54 = vsel %vm146_vm0, %v1613_v27, 0.0  ;;  %v1690_v19 = vmax.f32 %v1686_v48, 0.0 }
 0x201   :  { %v1667_v56 = vadd.f32 %v1666_v54, %v1665_v41  ;;  %v1694_v53 = vadd.f32 1e-05, %v1689_v5 }
 0x202   :  { %v1497_v11 = vadd.f32 %v1496_v30, %v1469_v58  ;;  %v1684_v4 = vsub.f32 %v1676_v35, %v1680_v28  ;;  %v1695_v27 = vadd.f32 1e-05, %v1690_v19 }
 0x203   :  { %2423 = vrsqrt.f32 %v1694_v53  ;;  %vm1713_vm5 = vweird.f32 %v1694_v53 }
 0x204   :  { %v3284_v31 = vadd.f32 %v1524_v14, %v1497_v11  ;;  %v1688_v1 = vmax.f32 %v1684_v4, 0.0  ;;  %2425 = vrsqrt.f32 %v1695_v27  ;;  %vm1723_vm8 = vweird.f32 %v1695_v27 }
 0x206   :  { %v1578_v17 = vsel %vm3431_vm2, %v3284_v31, 0.0  ;;  %v1617_v30 = vmul.f32 %v3284_v31, %v3284_v31  ;;  %v1693_v36 = vadd.f32 1e-05, %v1688_v1 }
 0x207   :  { %v1579_v2 = vadd.f32 %v1578_v17, %v1577_v9  ;;  %v1442_v25 = vpop.f32.mrf.mxu3  ;;  %v1526_v62 = vpop.f32.mrf.mxu2 }
 0x208   :  { %v1668_v55 = vsel %vm3431_vm2, %v1617_v30, 0.0  ;;  %2427 = vrsqrt.f32 %v1693_v36  ;;  %vm1703_vm14 = vweird.f32 %v1693_v36 }
 0x209   :  { %v1580_v50 = vrot.slane %v1579_v2, 4  ;;  %v1669_v33 = vadd.f32 %v1668_v55, %v1667_v56  ;;  %v2424_v11 = vpop.eup %2423 }
 0x20a   :  { %v2426_v32 = vpop.eup %2425  ;;  %v1708_v54 = vmul.f32 %v2424_v11, %v1694_v53  ;;  %vm1714_vm4 = vweird.f32 %v2424_v11 }
 0x20b   :  { %v1581_v14 = vadd.f32 %v1580_v50, %v1579_v2  ;;  %v1670_v21 = vrot.slane %v1669_v33, 4  ;;  %v1718_v9 = vmul.f32 %v2426_v32, %v1695_v27  ;;  %vm1724_vm6 = vweird.f32 %v2426_v32  ;;  %vm1715_vm7 = vmor %vm1713_vm5, %vm1714_vm4 }
 0x20c   :  { %v1709_v30 = vmul.f32 %v2424_v11, %v1708_v54  ;;  %vm1725_vm11 = vmor %vm1723_vm8, %vm1724_vm6 }
 0x20d   :  { %v1582_v58 = vrot.slane %v1581_v14, 2  ;;  %v1671_v24 = vadd.f32 %v1670_v21, %v1669_v33  ;;  %v1719_v2 = vmul.f32 %v2426_v32, %v1718_v9 }
 0x20e   :  { %v2428_v41 = vpop.eup %2427  ;;  %v1710_v25 = vmul.f32 0.5, %v1709_v30 }
 0x20f   :  { %v1583_v38 = vadd.f32 %v1582_v58, %v1581_v14  ;;  %v1672_v46 = vrot.slane %v1671_v24, 2  ;;  %v1698_v5 = vmul.f32 %v2428_v41, %v1693_v36  ;;  %v1720_v4 = vmul.f32 0.5, %v1719_v2 }
 0x210   :  { %v1711_v55 = vsub.f32 1.5, %v1710_v25  ;;  %vm1704_vm10 = vweird.f32 %v2428_v41 }
 0x211   :  { %v1584_v37 = vrot.slane %v1583_v38, 1  ;;  %v1673_v47 = vadd.f32 %v1672_v46, %v1671_v24  ;;  %v1699_v62 = vmul.f32 %v2428_v41, %v1698_v5  ;;  %v1721_v33 = vsub.f32 1.5, %v1720_v4  ;;  %vm1705_vm2 = vmor %vm1703_vm14, %vm1704_vm10 }
 0x212   :  { %v1712_v21 = vmul.f32 %v2424_v11, %v1711_v55 }
 0x213   :  { %v1585_v59 = vadd.f32 %v1584_v37, %v1583_v38  ;;  %v1674_v60 = vrot.slane %v1673_v47, 1  ;;  %v1700_v50 = vmul.f32 0.5, %v1699_v62  ;;  %v1722_v24 = vmul.f32 %v2426_v32, %v1721_v33 }
 0x214   :  { %v1716_v46 = vsel %vm1715_vm7, %v2424_v11, %v1712_v21 }
 0x215   :  { %v1589_v40 = vmul.f32 0.020408163, %v1585_v59  ;;  %v1675_v57 = vadd.f32 %v1674_v60, %v1673_v47  ;;  %v1701_v58 = vsub.f32 1.5, %v1700_v50  ;;  %v1726_v59 = vsel %vm1725_vm11, %v2426_v32, %v1722_v24 }
 0x216   :  { %v1742_v53 = vrot.slane %v1726_v59, 6 }
 0x217   :  { %v1679_v35 = vmul.f32 0.020408163, %v1675_v57  ;;  %v1683_v28 = vmul.f32 %v1589_v40, %v1589_v40  ;;  %v1702_v47 = vmul.f32 %v2428_v41, %v1701_v58  ;;  %v1741_v57 = vrot.slane %v1716_v46, 7 }
 0x219   :  { %v1687_v48 = vsub.f32 %v1679_v35, %v1683_v28  ;;  %v1706_v54 = vsel %vm1705_vm2, %v2428_v41, %v1702_v47 }
 0x21a   :  { %v1744_v11 = vsel %vm111_vm1, %v1706_v54, %v1741_v57 }
 0x21b   :  { %v1691_v17 = vmax.f32 %v1687_v48, 0.0  ;;  %v1692_v48 = vld [vmem:[#allocation8] ss:$2 sm:$0xf] }
 0x21d   :  { %v1696_v56 = vadd.f32 1e-05, %v1691_v17 }
 0x21f   :  { %2429 = vrsqrt.f32 %v1696_v56  ;;  %vm1733_vm12 = vweird.f32 %v1696_v56 }
 0x225   :  { %v2430_v19 = vpop.eup %2429 }
 0x226   :  { %v1728_v14 = vmul.f32 %v2430_v19, %v1696_v56  ;;  %vm1734_vm9 = vweird.f32 %v2430_v19 }
 0x227   :  { %vm1735_vm13 = vmor %vm1733_vm12, %vm1734_vm9 }
 0x228   :  { %v1729_v1 = vmul.f32 %v2430_v19, %v1728_v14 }
 0x22a   :  { %v1730_v38 = vmul.f32 0.5, %v1729_v1 }
 0x22c   :  { %v1731_v37 = vsub.f32 1.5, %v1730_v38 }
 0x22e   :  { %v1732_v60 = vmul.f32 %v2430_v19, %v1731_v37 }
 0x230   :  { %v1736_v35 = vsel %vm1735_vm13, %v2430_v19, %v1732_v60  ;;  %v1750_v19 = vld [vmem:[#allocation8 + $0x1] ss:$2 sm:$0xf] }
 0x231   :  { %v1743_v28 = vrot.slane %v1736_v35, 5 }
 0x233   :  { %v1745_v27 = vsel %vm326_vm15, %v1742_v53, %v1743_v28 }
 0x234   :  { %v1746_v9 = vsel %vm328_vm3, %v1744_v11, %v1745_v27 }
 0x235   :  { %v1748_v17 = vmul.f32 %v1746_v9, %v1692_v48 }
 0x237   :  { %v3294_v30 = vperm.slane %v1748_v17, 0  ;;  %v3296_v32 = vperm.slane %v1748_v17, 1  ;;  %v3298_v5 = vperm.slane %v1748_v17, 2  ;;  %v3300_v36 = vperm.slane %v1748_v17, 3 }
 0x239   :  { %v1761_v56 = vmul.f32 %v3296_v32, %v3250_v22  ;;  %v1762_v41 = vmul.f32 %v3298_v5, %v3261_v3  ;;  %v1763_v2 = vmul.f32 %v3300_v36, %v1589_v40  ;;  %v1760_v25 = vmul.f32 %v3294_v30, %v3248_v61 }
 0x23a   :  { %v1776_v22 = vmul.f32 %v3294_v30, %v3054_v15  ;;  %v1777_v3 = vmul.f32 %v3296_v32, %v3088_v45  ;;  %v1778_v61 = vmul.f32 %v3298_v5, %v3117_v23  ;;  %v1779_v1 = vmul.f32 %v3300_v36, %v3232_v0 }
 0x23b   :  { %v1768_v62 = vrot.slane %v1761_v56, 7  ;;  %v1769_v4 = vrot.slane %v1762_v41, 6  ;;  %v1770_v55 = vrot.slane %v1763_v2, 5  ;;  %v1780_v15 = vmul.f32 %v3294_v30, %v3056_v16 }
 0x23c   :  { %v1781_v45 = vmul.f32 %v3296_v32, %v3092_v42  ;;  %v1782_v47 = vmul.f32 %v3298_v5, %v3119_v12  ;;  %v1783_v16 = vmul.f32 %v3300_v36, %v3229_v6  ;;  %v1784_v42 = vmul.f32 %v3294_v30, %v3063_v39 }
 0x23d   :  { %v1771_v50 = vsel %vm111_vm1, %v1760_v25, %v1768_v62  ;;  %v1772_v33 = vsel %vm326_vm15, %v1769_v4, %v1770_v55  ;;  %v1785_v35 = vmul.f32 %v3296_v32, %v3097_v29  ;;  %v1786_v53 = vmul.f32 %v3298_v5, %v3121_v26  ;;  %v3455_v55 = vld [vmem:[#allocation18_spill] sm:$0xff] }
 0x23e   :  { %v1773_v14 = vsel %vm328_vm3, %v1771_v50, %v1772_v33  ;;  %v1787_v28 = vmul.f32 %v3300_v36, %v3234_v43  ;;  %v1788_v54 = vmul.f32 %v3294_v30, %v3065_v51  ;;  %v1789_v48 = vmul.f32 %v3296_v32, %v3101_v13  ;;  %v3456_v50 = vld [vmem:[#allocation15_spill] sm:$0xff] }
 0x23f   :  { %v1775_v21 = vsub.f32 %v1750_v19, %v1773_v14  ;;  %v1790_v11 = vmul.f32 %v3298_v5, %v3123_v63  ;;  %v1791_v27 = vmul.f32 %v3300_v36, %v3238_v7  ;;  %v1792_v9 = vmul.f32 %v3294_v30, %v3072_v8  ;;  %v3457_v14 = vld [vmem:[#allocation19_spill] sm:$0xff] }
 0x240   :  { %v1793_v17 = vmul.f32 %v3296_v32, %v3106_v49  ;;  %v1794_v56 = vmul.f32 %v3298_v5, %v3125_v20  ;;  %v1795_v41 = vmul.f32 %v3300_v36, %v3246_v18  ;;  %v1796_v2 = vmul.f32 %v3294_v30, %v3074_v34 }
 0x241   :  { %v3318_v40 = vperm.slane %v1775_v21, 0  ;;  %v3322_v58 = vperm.slane %v1775_v21, 1  ;;  %v3324_v24 = vperm.slane %v1775_v21, 2  ;;  %v3326_v38 = vperm.slane %v1775_v21, 3 }
 0x242   :  { %v1797_v25 = vmul.f32 %v3296_v32, %v3110_v44  ;;  %v1798_v62 = vmul.f32 %v3298_v5, %v3127_v52  ;;  %v1799_v4 = vmul.f32 %v3300_v36, %v3259_v10  ;;  %v1800_v19 = vmul.f32 %v3294_v30, %v3455_v55 }
 0x243   :  { %v1813_v46 = vadd.f32 %v3318_v40, %v1776_v22  ;;  %v1814_v23 = vadd.f32 %v3322_v58, %v1777_v3  ;;  %v1815_v37 = vadd.f32 %v3324_v24, %v1778_v61  ;;  %v1816_v0 = vadd.f32 %v3326_v38, %v1779_v1 }
 0x244   :  { %v1817_v59 = vadd.f32 %v3318_v40, %v1780_v15  ;;  %v1818_v60 = vadd.f32 %v3322_v58, %v1781_v45  ;;  %v1819_v57 = vadd.f32 %v3324_v24, %v1782_v47  ;;  %v1820_v12 = vadd.f32 %v3326_v38, %v1783_v16 }
 0x245   :  { %1841 = vst [vmem:[#allocation10] sm:$0xff] %v1813_v46  ;;  %v1821_v6 = vadd.f32 %v3318_v40, %v1784_v42  ;;  %v1822_v39 = vadd.f32 %v3322_v58, %v1785_v35  ;;  %v1823_v29 = vadd.f32 %v3324_v24, %v1786_v53  ;;  %v1824_v26 = vadd.f32 %v3326_v38, %v1787_v28 }
 0x246   :  { %1842 = vst [vmem:[#allocation10 + $0x8] sm:$0xff] %v1814_v23  ;;  %v1825_v43 = vadd.f32 %v3318_v40, %v1788_v54  ;;  %v1826_v51 = vadd.f32 %v3322_v58, %v1789_v48  ;;  %v1827_v13 = vadd.f32 %v3324_v24, %v1790_v11  ;;  %v1828_v63 = vadd.f32 %v3326_v38, %v1791_v27 }
 0x247   :  { %1843 = vst [vmem:[#allocation10 + $0x10] sm:$0xff] %v1815_v37  ;;  %v1829_v7 = vadd.f32 %v3318_v40, %v1792_v9  ;;  %v1830_v8 = vadd.f32 %v3322_v58, %v1793_v17  ;;  %v1831_v49 = vadd.f32 %v3324_v24, %v1794_v56  ;;  %v1832_v20 = vadd.f32 %v3326_v38, %v1795_v41 }
 0x248   :  { %1844 = vst.msk [vmem:[#allocation10 + $0x18] sm:$0xff] %vm146_vm0, %v1816_v0  ;;  %v1833_v18 = vadd.f32 %v3318_v40, %v1796_v2  ;;  %v1834_v34 = vadd.f32 %v3322_v58, %v1797_v25  ;;  %v1835_v44 = vadd.f32 %v3324_v24, %v1798_v62  ;;  %v1801_v33 = vmul.f32 %v3296_v32, %v3456_v50 }
 0x249   :  { %1845 = vst [vmem:[#allocation10 + $0x20] sm:$0xff] %v1817_v59  ;;  %v1836_v52 = vadd.f32 %v3326_v38, %v1799_v4  ;;  %v1802_v21 = vmul.f32 %v3298_v5, %v3457_v14  ;;  %v1837_v10 = vadd.f32 %v3318_v40, %v1800_v19  ;;  %v1803_v22 = vmul.f32 %v3300_v36, %v3284_v31 }
 0x24a   :  { %1846 = vst [vmem:[#allocation10 + $0x28] sm:$0xff] %v1818_v60  ;;  %v1838_v30 = vadd.f32 %v3322_v58, %v1801_v33  ;;  %vm3458_vm1 = vcmask 122880  }
 0x24b   :  { %1847 = vst [vmem:[#allocation10 + $0x30] sm:$0xff] %v1819_v57  ;;  %v1839_v3 = vadd.f32 %v3324_v24, %v1802_v21  ;;  %v1840_v32 = vadd.f32 %v3326_v38, %v1803_v22 }
 0x24c   :  { %1848 = vst.msk [vmem:[#allocation10 + $0x38] sm:$0xff] %vm146_vm0, %v1820_v12 }
 0x24d   :  { %1849 = vst [vmem:[#allocation10 + $0x40] sm:$0xff] %v1821_v6 }
 0x24e   :  { %1850 = vst [vmem:[#allocation10 + $0x48] sm:$0xff] %v1822_v39 }
 0x24f   :  { %1851 = vst [vmem:[#allocation10 + $0x50] sm:$0xff] %v1823_v29 }
 0x250   :  { %1852 = vst.msk [vmem:[#allocation10 + $0x58] sm:$0xff] %vm146_vm0, %v1824_v26 }
 0x251   :  { %1853 = vst [vmem:[#allocation10 + $0x60] sm:$0xff] %v1825_v43 }
 0x252   :  { %1854 = vst [vmem:[#allocation10 + $0x68] sm:$0xff] %v1826_v51 }
 0x253   :  { %1855 = vst [vmem:[#allocation10 + $0x70] sm:$0xff] %v1827_v13 }
 0x254   :  { %1856 = vst.msk [vmem:[#allocation10 + $0x78] sm:$0xff] %vm146_vm0, %v1828_v63 }
 0x255   :  { %1857 = vst [vmem:[#allocation10 + $0x80] sm:$0xff] %v1829_v7 }
 0x256   :  { %1858 = vst [vmem:[#allocation10 + $0x88] sm:$0xff] %v1830_v8 }
 0x257   :  { %1859 = vst [vmem:[#allocation10 + $0x90] sm:$0xff] %v1831_v49 }
 0x258   :  { %1860 = vst.msk [vmem:[#allocation10 + $0x98] sm:$0xff] %vm146_vm0, %v1832_v20 }
 0x259   :  { %1861 = vst [vmem:[#allocation10 + $0xa0] sm:$0xff] %v1833_v18 }
 0x25a   :  { %1862 = vst [vmem:[#allocation10 + $0xa8] sm:$0xff] %v1834_v34 }
 0x25b   :  { %1863 = vst [vmem:[#allocation10 + $0xb0] sm:$0xff] %v1835_v44 }
 0x25c   :  { %1864 = vst.msk [vmem:[#allocation10 + $0xb8] sm:$0xff] %vm146_vm0, %v1836_v52 }
 0x25d   :  { %1865 = vst [vmem:[#allocation10 + $0xc0] sm:$0x1] %v1837_v10 }
 0x25e   :  { %1866 = vst [vmem:[#allocation10 + $0xc8] sm:$0x1] %v1838_v30 }
 0x25f   :  { %1867 = vst [vmem:[#allocation10 + $0xd0] sm:$0x1] %v1839_v3 }
 0x260   :  { %1868 = vst.msk [vmem:[#allocation10 + $0xd8] sm:$0x1] %vm3458_vm1, %v1840_v32 }
 0x261   :  { %1881 = dma.vmem_to_hbm [thread:$0]  %s1874_s3, 3584, %s1876_s13, [#allocation4], %s2561_s25, %s2561_s25, %s2562_s26  }
 0x262   :  { %2557 = dma.done.wait [#allocation4], 3584  }
 0x263   :  { %2558 = vsyncadd [#allocation4], 4294963712 }
 0x264   :  { %1886 = vsyncpa [#allocation3], 1 }
 0x265   :  { %1887 = vsyncpa [#allocation6], 1 }
 0x266   :  { %1888 = vsyncpa [#allocation9], 1 }
 0x267   :  { %1889 = vsyncpa [#allocation4], 1 }

</bundles_post_ra>
